<compile_context>
chip_gen: v6e
topology: v6e:2x2x1
jax: 0.10.0
libtpu: 0.0.40
codegen_flags: <defaults>
</compile_context>

<pallas_src>
import functools

import jax
import jax.numpy as jnp
import numpy as np
from jax.experimental import pallas as pl
from jax.experimental.pallas import tpu as pltpu


def decoder_kernel(qT_ref, pp_ref, feaT_ref,
                   wpT_ref, bpT_ref,
                   wcT_ref, bcT_ref,
                   w0T_ref, b0T_ref,
                   w1T_ref, b1T_ref,
                   wout_ref, bout_ref,
                   out_ref, acc_ref,
                   *, n_blocks, hidden, c_dim, dim, inv_var, n_mchunks,
                   mxu_dtype, field_dtype, exact_eps, approx_recip):
    """One (batch, query-tile) grid step.  Activations are feature-major (H, TN)."""
    f32 = jnp.float32
    qT = qT_ref[0]                                   # (dim, TN) query positions

    def mm(a, b):   # MXU dot; optional bf16 operands, always f32 accumulation
        return jnp.dot(a.astype(mxu_dtype), b.astype(mxu_dtype),
                       preferred_element_type=f32)

    # ---- sample_point_feature (gaussian), context axis chunked ----------------
    def field_chunk(mi):
        pp_blk = pp_ref[0, mi]                       # (MC, dim)  context positions
        fea_blk = feaT_ref[0, mi]                    # (C+1, MC)  features, row C = 1
        # Direct squared distance on the VPU: exact (no ||p||^2+||q||^2-2p.q
        # cancellation) and no K=dim MXU pass producing the full (MC, TN) field.
        diff = pp_blk[:, 0:1] - qT[0:1, :]           # (MC, TN) broadcast
        sqd = diff * diff
        for d in range(1, dim):
            diff = pp_blk[:, d:d + 1] - qT[d:d + 1, :]
            sqd = sqd + diff * diff
        if exact_eps:
            # (norm + 1e-5)^2 = sqd + 2e-5*norm + 1e-10; the 1e-10 constant
            # cancels in the softmax normalization, only the norm term remains.
            sqd = sqd + 2e-5 * jnp.sqrt(sqd)
        # logits <= 0 so exp never overflows; all-underflow (0/0) matches the
        # PyTorch reference exactly (no max-subtraction needed or applied).
        w = jnp.exp((sqd * (-inv_var)).astype(field_dtype))        # (MC, TN)
        # (C+1, MC) @ (MC, TN): row C of the result is the softmax denominator
        # (ones row appended in the wrapper) -> no separate column reduction.
        return jnp.dot(fea_blk, w, preferred_element_type=f32)

    if n_mchunks == 1:
        acc = field_chunk(0)                                       # (C+1, TN)
    else:
        acc_ref[...] = jnp.zeros_like(acc_ref)

        @pl.loop(0, n_mchunks)
        def _(mi):
            acc_ref[...] += field_chunk(mi)

        acc = acc_ref[...]

    colsum = acc[c_dim:c_dim + 1, :]                               # (1, TN)
    inv = pl.reciprocal(colsum, approx=True) if approx_recip else 1.0 / colsum
    cT = acc[:c_dim, :] * inv            # softmax normalization post-matmul

    # ---- fc_p (K=dim is tiny; keep f32) ---------------------------------------
    net = jnp.dot(wpT_ref[...], qT, preferred_element_type=f32) + bpT_ref[...]

    # ---- fused conditioning: one (nb*H, C) @ (C, TN) MXU call ------------------
    cproj = mm(wcT_ref[...], cT) + bcT_ref[...]                    # (nb*H, TN)

    # ---- ResNet blocks (identity shortcut since size_in == size_out) ----------
    for i in range(n_blocks):
        net = net + cproj[i * hidden:(i + 1) * hidden, :]
        h = mm(w0T_ref[i], jnp.maximum(net, 0.0)) + b0T_ref[i]
        dx = mm(w1T_ref[i], jnp.maximum(h, 0.0)) + b1T_ref[i]
        net = net + dx

    # ---- fc_out: lane-dense (1, TN) row ----------------------------------------
    out = (jnp.sum(jnp.maximum(net, 0.0) * wout_ref[...], axis=0, keepdims=True)
           + bout_ref[...])
    out_ref[...] = out[None, :, :]


def _vmem_capacity_bytes():
    """Capability probe only (never masks a kernel error).

    Falls back to the smallest per-core VMEM in the fleet (v7x, 64 MiB)."""
    try:
        return int(pltpu.get_tpu_info().vmem_capacity_bytes)
    except Exception:
        return 64 * 1024 * 1024


def local_point_decoder(q, pp, fea, params, *, var, tn=None, m_chunk=512,
                        mxu_dtype=jnp.float32, exact_eps=False,
                        approx_recip=None):
    """JAX wrapper: layout plumbing (transpose / pad / specs) around the kernel."""
    B, N, dim = q.shape
    M = pp.shape[1]
    C = fea.shape[2]
    H = params["wp"].shape[1]
    nb = params["wc"].shape[0]
    field_dtype = mxu_dtype
    if approx_recip is None:
        approx_recip = (mxu_dtype == jnp.bfloat16)

    vmem_cap = _vmem_capacity_bytes()
    big_vmem = vmem_cap >= 96 * 1024 * 1024

    # Query tile (lane axis, multiple of 128).  Generation-aware default:
    # 1024 on 128 MiB parts (v5e/v6e), 512 on 64 MiB parts (v7x).
    n128 = pl.cdiv(N, 128)
    if tn is None:
        tn = 1024 if big_vmem else 512
    tn = max(128, min(128 * n128, 128 * pl.cdiv(tn, 128)))
    if B == 1 and n128 >= 2:
        # keep >= 2 query tiles so both v7x TensorCores get work
        tn = min(tn, 128 * pl.cdiv(n128, 2))
    n_tiles = pl.cdiv(N, tn)
    n_pad = n_tiles * tn

    # Context (M) chunk: bounds the (MC, TN) weight-field temporaries in VMEM.
    mc = min(int(m_chunk), 8 * pl.cdiv(M, 8))
    if M > mc:
        mc = 128 * pl.cdiv(mc, 128)
    mc = max(8, mc)
    n_mchunks = pl.cdiv(M, mc)
    m_pad = n_mchunks * mc

    # ---- layout plumbing -------------------------------------------------------
    if n_pad != N:
        q = jnp.pad(q, ((0, 0), (0, n_pad - N), (0, 0)))
    qT = jnp.transpose(q, (0, 2, 1)).astype(jnp.float32)       # (B, dim, n_pad)

    pp = pp.astype(jnp.float32)
    if m_pad != M:
        # pad with far-away points: exp underflows to exactly 0 -> no effect
        pp = jnp.pad(pp, ((0, 0), (0, m_pad - M), (0, 0)), constant_values=1e6)
    pp_cm = pp.reshape(B, n_mchunks, mc, dim)                  # chunk-major

    feaT = jnp.transpose(fea, (0, 2, 1))                       # (B, C, M)
    ones = jnp.ones((B, 1, M), feaT.dtype)
    feaT = jnp.concatenate([feaT, ones], axis=1)               # (B, C+1, M), row C = 1
    if m_pad != M:
        feaT = jnp.pad(feaT, ((0, 0), (0, 0), (0, m_pad - M)))
    feaT_cm = (feaT.reshape(B, C + 1, n_mchunks, mc)
               .transpose(0, 2, 1, 3)                          # (B, n_mchunks, C+1, mc)
               .astype(field_dtype))                           # pre-cast (halves DMA on bf16)

    # PyTorch-style (out, in) weights so the kernel computes W @ x.
    # Pre-cast the MXU weight operands; positions / biases / fc_out stay f32.
    wpT = jnp.transpose(params["wp"]).astype(jnp.float32)                     # (H, dim)
    bpT = jnp.transpose(params["bp"]).astype(jnp.float32)                     # (H, 1)
    wcT = jnp.transpose(params["wc"], (0, 2, 1)).reshape(nb * H, C).astype(mxu_dtype)
    bcT = jnp.transpose(params["bc"], (0, 2, 1)).reshape(nb * H, 1).astype(jnp.float32)
    w0T = jnp.transpose(params["w0"], (0, 2, 1)).astype(mxu_dtype)            # (nb, H, H)
    b0T = jnp.transpose(params["b0"], (0, 2, 1)).astype(jnp.float32)          # (nb, H, 1)
    w1T = jnp.transpose(params["w1"], (0, 2, 1)).astype(mxu_dtype)
    b1T = jnp.transpose(params["b1"], (0, 2, 1)).astype(jnp.float32)
    wout = params["wout"].astype(jnp.float32)                                 # (H, 1)
    bout = params["bout"].astype(jnp.float32)                                 # (1, 1)

    kernel = functools.partial(
        decoder_kernel, n_blocks=nb, hidden=H, c_dim=C, dim=dim,
        inv_var=float(1.0 / var), n_mchunks=n_mchunks,
        mxu_dtype=mxu_dtype, field_dtype=field_dtype,
        exact_eps=bool(exact_eps), approx_recip=bool(approx_recip))

    grid = (B, n_tiles)

    # Advisory cost estimate for XLA scheduling around the custom call.
    flops = int(B * n_pad * (m_pad * (3 * dim + 2) + 2 * m_pad * (C + 1)
                             + 2 * dim * H + 2 * C * nb * H
                             + nb * (4 * H * H + 6 * H) + 3 * H))
    transcendentals = int(B * n_pad * (m_pad * (2 if exact_eps else 1) + 1))
    operands = (qT, pp_cm, feaT_cm, wpT, bpT, wcT, bcT, w0T, b0T, w1T, b1T, wout, bout)
    bytes_accessed = int(sum(int(x.size) * x.dtype.itemsize for x in operands)
                         + B * n_pad * 4)

    # Explicit VMEM budget from the chosen tiles (default scoped limit is only
    # 16/32 MiB); cap is generation-aware with headroom below physical VMEM.
    weight_bytes = sum(int(x.size) * x.dtype.itemsize
                       for x in (wpT, bpT, wcT, bcT, w0T, b0T, w1T, b1T, wout, bout))
    fbytes = jnp.dtype(field_dtype).itemsize
    per_step_bytes = (
        2 * dim * tn * 4 + 2 * tn * 4                            # q / out tiles (dbl-buffered)
        + 2 * m_pad * dim * 4 + 2 * (C + 1) * m_pad * fbytes     # pp / fea^T blocks
        + 2 * weight_bytes                                       # weights (dbl-buffered)
        + 6 * mc * tn * 4                                        # live (MC, TN) temporaries
        + (C + 1) * tn * 4                                       # accumulator scratch
        + (nb * H + 6 * H) * tn * 4)                             # cproj + activations
    cap = max(min(vmem_cap - 8 * 1024 * 1024, 100 * 1024 * 1024), 32 * 1024 * 1024)
    vmem_limit = int(min(max(2 * per_step_bytes, 32 * 1024 * 1024), cap))

    def wspec(shape):
        # Grid-invariant weights: constant index_map (no per-step re-DMA).  They
        # total only ~weight_bytes << VMEM, so default double-buffering is
        # negligible and no Buffered(1) / fallback path is needed.
        return pl.BlockSpec(shape, lambda *_: (0,) * len(shape))

    in_specs = [
        pl.BlockSpec((1, dim, tn), lambda b, n: (b, 0, n)),                 # q^T
        pl.BlockSpec((1, n_mchunks, mc, dim), lambda b, n: (b, 0, 0, 0)),   # pp (chunked)
        pl.BlockSpec((1, n_mchunks, C + 1, mc), lambda b, n: (b, 0, 0, 0)), # fea^T + ones
        wspec((H, dim)), wspec((H, 1)),                                     # fc_p
        wspec((nb * H, C)), wspec((nb * H, 1)),                             # fc_c (fused)
        wspec((nb, H, H)), wspec((nb, H, 1)),                               # blocks fc_0
        wspec((nb, H, H)), wspec((nb, H, 1)),                               # blocks fc_1
        wspec((H, 1)), wspec((1, 1)),                                       # fc_out
    ]

    out = pl.pallas_call(
        kernel,
        out_shape=jax.ShapeDtypeStruct((B, 1, n_pad), jnp.float32),
        grid=grid,
        in_specs=in_specs,
        out_specs=pl.BlockSpec((1, 1, tn), lambda b, n: (b, 0, n)),
        scratch_shapes=[pltpu.VMEM((C + 1, tn), jnp.float32)],
        compiler_params=pltpu.CompilerParams(
            dimension_semantics=("parallel", "parallel"),
            vmem_limit_bytes=vmem_limit),
        cost_estimate=pl.CostEstimate(
            flops=flops, transcendentals=transcendentals,
            bytes_accessed=bytes_accessed),
    )(qT, pp_cm, feaT_cm, wpT, bpT, wcT, bcT, w0T, b0T, w1T, b1T, wout, bout)

    return out[:, 0, :N]   # drop query padding; lane-dense (B, N)


def reference_decoder(q, pp, fea, params, *, var):
    """Pure-JAX reference matching the PyTorch forward pass (f32-exact matmuls)."""
    hi = jax.lax.Precision.HIGHEST
    nb = params["wc"].shape[0]
    diff = pp[:, None, :, :] - q[:, :, None, :]                 # (B, N, M, dim)
    norm = jnp.linalg.norm(diff, axis=3)
    dist = -((norm + 1e-5) ** 2)
    w = jnp.exp(dist / var)
    w = w / jnp.sum(w, axis=2, keepdims=True)
    c = jnp.einsum("bnm,bmc->bnc", w, fea, precision=hi)
    net = jnp.dot(q, params["wp"], precision=hi) + params["bp"][0]
    for i in range(nb):
        net = net + jnp.dot(c, params["wc"][i], precision=hi) + params["bc"][i, 0]
        h = jnp.dot(jax.nn.relu(net), params["w0"][i], precision=hi) + params["b0"][i, 0]
        dx = jnp.dot(jax.nn.relu(h), params["w1"][i], precision=hi) + params["b1"][i, 0]
        net = net + dx
    out = jnp.dot(jax.nn.relu(net), params["wout"], precision=hi) + params["bout"][0]
    return out[..., 0]


def init_params(key, *, dim, c_dim, hidden, n_blocks):
    """Deterministic synthetic params; weights stored as (in, out) so the
    reference computes x @ W (equivalent to PyTorch x @ W_pt.T)."""
    ks = jax.random.split(key, 10)
    s = 0.1
    return {
        "wp": s * jax.random.normal(ks[0], (dim, hidden), jnp.float32),
        "bp": s * jax.random.normal(ks[1], (1, hidden), jnp.float32),
        "wc": s * jax.random.normal(ks[2], (n_blocks, c_dim, hidden), jnp.float32),
        "bc": s * jax.random.normal(ks[3], (n_blocks, 1, hidden), jnp.float32),
        "w0": s * jax.random.normal(ks[4], (n_blocks, hidden, hidden), jnp.float32),
        "b0": s * jax.random.normal(ks[5], (n_blocks, 1, hidden), jnp.float32),
        "w1": s * jax.random.normal(ks[6], (n_blocks, hidden, hidden), jnp.float32),
        "b1": s * jax.random.normal(ks[7], (n_blocks, 1, hidden), jnp.float32),
        "wout": s * jax.random.normal(ks[8], (hidden, 1), jnp.float32),
        "bout": s * jax.random.normal(ks[9], (1, 1), jnp.float32),
    }


if __name__ == "__main__":
    # Small, module-consistent shapes (dim=3 points, c_dim=hidden=32, 5 blocks).
    B, N, M = 2, 200, 200       # batch, query points, context points
    dim, c_dim, hidden, n_blocks = 3, 32, 32, 5
    gaussian_val = 0.2
    var = gaussian_val ** 2

    key = jax.random.PRNGKey(0)
    kq, kp, kf, kw = jax.random.split(key, 4)
    q = jax.random.uniform(kq, (B, N, dim), jnp.float32)      # query points p
    pp = jax.random.uniform(kp, (B, M, dim), jnp.float32)     # context positions
    fea = jax.random.normal(kf, (B, M, c_dim), jnp.float32)   # context features
    params = init_params(kw, dim=dim, c_dim=c_dim, hidden=hidden, n_blocks=n_blocks)

    ref = jax.block_until_ready(reference_decoder(q, pp, fea, params, var=var))

    # 1) f32, exact eps semantics (keeps the sqrt term); tn=128 exercises the
    #    multi-tile grid + query padding (200 -> 256).
    out = jax.block_until_ready(
        local_point_decoder(q, pp, fea, params, var=var, tn=128, exact_eps=True))
    assert out.shape == (B, N), out.shape
    np.testing.assert_allclose(np.asarray(out), np.asarray(ref), rtol=5e-4, atol=5e-4)

    # 2) f32 fast path (default): drops the 1e-5 eps inside the square, removing
    #    the sqrt over the (M, TN) field (|delta log-weight| <= 2e-5*norm/var).
    out_fast = jax.block_until_ready(local_point_decoder(q, pp, fea, params, var=var))
    np.testing.assert_allclose(np.asarray(out_fast), np.asarray(ref),
                               rtol=3e-3, atol=3e-3)

    # 3) f32 fast path with context chunking (m_chunk=128 -> 2 chunks; M padded
    #    200 -> 256 with far-away points contributing exactly zero weight).
    out_chunk = jax.block_until_ready(
        local_point_decoder(q, pp, fea, params, var=var, m_chunk=128))
    np.testing.assert_allclose(np.asarray(out_chunk), np.asarray(ref),
                               rtol=3e-3, atol=3e-3)

    # 4) bf16-MXU / bf16-field fast path (f32 accumulation & normalization).
    out_bf16 = jax.block_until_ready(
        local_point_decoder(q, pp, fea, params, var=var, mxu_dtype=jnp.bfloat16))
    np.testing.assert_allclose(np.asarray(out_bf16), np.asarray(ref),
                               rtol=5e-2, atol=5e-2)

    # TODO(synk): only sample_mode='gaussian' with c_dim != 0 is implemented;
    # the 1/(norm+eps) sampling mode and c_dim==0 branch are not replicated.
    # TODO(synk): the PyTorch n_points >= 30000 branch only chunks queries to
    # bound memory; the query-tile grid axis here serves the same purpose.
    print("KERNEL_OK")
</pallas_src>

<mosaic_0001>
module attributes {stable_mosaic.version = 11 : i64} {
  func.func @decoder_kernel(%arg0: i32, %arg1: i32, %arg2: memref<1x3x128xf32, #tpu.memory_space<vmem>>, %arg3: memref<1x1x200x3xf32, #tpu.memory_space<vmem>>, %arg4: memref<1x1x33x200xf32, #tpu.memory_space<vmem>>, %arg5: memref<32x3xf32, #tpu.memory_space<vmem>>, %arg6: memref<32x1xf32, #tpu.memory_space<vmem>>, %arg7: memref<160x32xf32, #tpu.memory_space<vmem>>, %arg8: memref<160x1xf32, #tpu.memory_space<vmem>>, %arg9: memref<5x32x32xf32, #tpu.memory_space<vmem>>, %arg10: memref<5x32x1xf32, #tpu.memory_space<vmem>>, %arg11: memref<5x32x32xf32, #tpu.memory_space<vmem>>, %arg12: memref<5x32x1xf32, #tpu.memory_space<vmem>>, %arg13: memref<32x1xf32, #tpu.memory_space<vmem>>, %arg14: memref<1x1xf32, #tpu.memory_space<vmem>>, %arg15: memref<1x1x128xf32, #tpu.memory_space<vmem>>, %arg16: memref<33x128xf32, #tpu.memory_space<vmem>>) attributes {dimension_semantics = [#tpu.dimension_semantics<parallel>, #tpu.dimension_semantics<parallel>], iteration_bounds = array<i64: 2, 2>, scalar_prefetch = 0 : i64, scratch_operands = 1 : i64, tpu.core_type = #tpu.core_type<tc>, window_params = [{transform_indices = @transform_0, window_bounds = array<i64: 1, 3, 128>}, {transform_indices = @transform_1, window_bounds = array<i64: 1, 1, 200, 3>}, {transform_indices = @transform_2, window_bounds = array<i64: 1, 1, 33, 200>}, {pipeline_mode = #tpu.pipeline_mode<synchronous>, transform_indices = @transform_3, window_bounds = array<i64: 32, 3>}, {pipeline_mode = #tpu.pipeline_mode<synchronous>, transform_indices = @transform_4, window_bounds = array<i64: 32, 1>}, {pipeline_mode = #tpu.pipeline_mode<synchronous>, transform_indices = @transform_5, window_bounds = array<i64: 160, 32>}, {pipeline_mode = #tpu.pipeline_mode<synchronous>, transform_indices = @transform_6, window_bounds = array<i64: 160, 1>}, {pipeline_mode = #tpu.pipeline_mode<synchronous>, transform_indices = @transform_7, window_bounds = array<i64: 5, 32, 32>}, {pipeline_mode = #tpu.pipeline_mode<synchronous>, transform_indices = @transform_8, window_bounds = array<i64: 5, 32, 1>}, {pipeline_mode = #tpu.pipeline_mode<synchronous>, transform_indices = @transform_9, window_bounds = array<i64: 5, 32, 32>}, {pipeline_mode = #tpu.pipeline_mode<synchronous>, transform_indices = @transform_10, window_bounds = array<i64: 5, 32, 1>}, {pipeline_mode = #tpu.pipeline_mode<synchronous>, transform_indices = @transform_11, window_bounds = array<i64: 32, 1>}, {pipeline_mode = #tpu.pipeline_mode<synchronous>, transform_indices = @transform_12, window_bounds = array<i64: 1, 1>}, {transform_indices = @transform_13, window_bounds = array<i64: 1, 1, 128>}]} {
    %c0 = arith.constant 0 : index
    %c0_0 = arith.constant 0 : index
    %c0_1 = arith.constant 0 : index
    %0 = vector.load %arg2[%c0, %c0_0, %c0_1] : memref<1x3x128xf32, #tpu.memory_space<vmem>>, vector<1x3x128xf32>
    %1 = vector.shape_cast %0 : vector<1x3x128xf32> to vector<3x128xf32>
    %c0_2 = arith.constant 0 : index
    %c0_3 = arith.constant 0 : index
    %c0_4 = arith.constant 0 : index
    %c0_5 = arith.constant 0 : index
    %2 = vector.load %arg3[%c0_2, %c0_3, %c0_4, %c0_5] : memref<1x1x200x3xf32, #tpu.memory_space<vmem>>, vector<1x1x200x3xf32>
    %3 = vector.shape_cast %2 : vector<1x1x200x3xf32> to vector<200x3xf32>
    %c0_6 = arith.constant 0 : index
    %c0_7 = arith.constant 0 : index
    %c0_8 = arith.constant 0 : index
    %c0_9 = arith.constant 0 : index
    %4 = vector.load %arg4[%c0_6, %c0_7, %c0_8, %c0_9] : memref<1x1x33x200xf32, #tpu.memory_space<vmem>>, vector<1x1x33x200xf32>
    %5 = vector.shape_cast %4 : vector<1x1x33x200xf32> to vector<33x200xf32>
    %6 = vector.extract_strided_slice %3 {offsets = [0, 0], sizes = [200, 1], strides = [1, 1]} : vector<200x3xf32> to vector<200x1xf32>
    %7 = vector.extract_strided_slice %1 {offsets = [0, 0], sizes = [1, 128], strides = [1, 1]} : vector<3x128xf32> to vector<1x128xf32>
    %8 = vector.broadcast %6 : vector<200x1xf32> to vector<200x128xf32>
    %9 = vector.broadcast %7 : vector<1x128xf32> to vector<200x128xf32>
    %10 = arith.subf %8, %9 : vector<200x128xf32>
    %11 = arith.mulf %10, %10 : vector<200x128xf32>
    %12 = vector.extract_strided_slice %3 {offsets = [0, 1], sizes = [200, 1], strides = [1, 1]} : vector<200x3xf32> to vector<200x1xf32>
    %13 = vector.extract_strided_slice %1 {offsets = [1, 0], sizes = [1, 128], strides = [1, 1]} : vector<3x128xf32> to vector<1x128xf32>
    %14 = vector.broadcast %12 : vector<200x1xf32> to vector<200x128xf32>
    %15 = vector.broadcast %13 : vector<1x128xf32> to vector<200x128xf32>
    %16 = arith.subf %14, %15 : vector<200x128xf32>
    %17 = arith.mulf %16, %16 : vector<200x128xf32>
    %18 = arith.addf %11, %17 : vector<200x128xf32>
    %19 = vector.extract_strided_slice %3 {offsets = [0, 2], sizes = [200, 1], strides = [1, 1]} : vector<200x3xf32> to vector<200x1xf32>
    %20 = vector.extract_strided_slice %1 {offsets = [2, 0], sizes = [1, 128], strides = [1, 1]} : vector<3x128xf32> to vector<1x128xf32>
    %21 = vector.broadcast %19 : vector<200x1xf32> to vector<200x128xf32>
    %22 = vector.broadcast %20 : vector<1x128xf32> to vector<200x128xf32>
    %23 = arith.subf %21, %22 : vector<200x128xf32>
    %24 = arith.mulf %23, %23 : vector<200x128xf32>
    %25 = arith.addf %18, %24 : vector<200x128xf32>
    %26 = math.sqrt %25 : vector<200x128xf32>
    %cst = arith.constant 2.000000e-05 : f32
    %27 = vector.broadcast %cst : f32 to vector<200x128xf32>
    %28 = arith.mulf %27, %26 : vector<200x128xf32>
    %29 = arith.addf %25, %28 : vector<200x128xf32>
    %cst_10 = arith.constant -2.500000e+01 : f32
    %30 = vector.broadcast %cst_10 : f32 to vector<200x128xf32>
    %31 = arith.mulf %29, %30 : vector<200x128xf32>
    %32 = math.exp %31 : vector<200x128xf32>
    %cst_11 = arith.constant dense<0.000000e+00> : vector<33x128xf32>
    %33 = tpu.matmul %5, %32, %cst_11 {dimension_numbers = #tpu.dot_dimension_numbers<[1], [0], [0], [1], [0, 0, 1, 1], [], []>} : vector<33x200xf32>, vector<200x128xf32>, vector<33x128xf32> -> vector<33x128xf32>
    %34 = vector.extract_strided_slice %33 {offsets = [32, 0], sizes = [1, 128], strides = [1, 1]} : vector<33x128xf32> to vector<1x128xf32>
    %cst_12 = arith.constant 1.000000e+00 : f32
    %35 = vector.broadcast %cst_12 : f32 to vector<1x128xf32>
    %36 = arith.divf %35, %34 : vector<1x128xf32>
    %37 = vector.extract_strided_slice %33 {offsets = [0, 0], sizes = [32, 128], strides = [1, 1]} : vector<33x128xf32> to vector<32x128xf32>
    %38 = vector.broadcast %36 : vector<1x128xf32> to vector<32x128xf32>
    %39 = arith.mulf %37, %38 : vector<32x128xf32>
    %c0_13 = arith.constant 0 : index
    %c0_14 = arith.constant 0 : index
    %40 = vector.load %arg5[%c0_13, %c0_14] : memref<32x3xf32, #tpu.memory_space<vmem>>, vector<32x3xf32>
    %cst_15 = arith.constant dense<0.000000e+00> : vector<32x128xf32>
    %41 = tpu.matmul %40, %1, %cst_15 {dimension_numbers = #tpu.dot_dimension_numbers<[1], [0], [0], [1], [0, 0, 1, 1], [], []>} : vector<32x3xf32>, vector<3x128xf32>, vector<32x128xf32> -> vector<32x128xf32>
    %c0_16 = arith.constant 0 : index
    %c0_17 = arith.constant 0 : index
    %42 = vector.load %arg6[%c0_16, %c0_17] : memref<32x1xf32, #tpu.memory_space<vmem>>, vector<32x1xf32>
    %43 = vector.broadcast %42 : vector<32x1xf32> to vector<32x128xf32>
    %44 = arith.addf %41, %43 : vector<32x128xf32>
    %c0_18 = arith.constant 0 : index
    %c0_19 = arith.constant 0 : index
    %45 = vector.load %arg7[%c0_18, %c0_19] : memref<160x32xf32, #tpu.memory_space<vmem>>, vector<160x32xf32>
    %cst_20 = arith.constant dense<0.000000e+00> : vector<160x128xf32>
    %46 = tpu.matmul %45, %39, %cst_20 {dimension_numbers = #tpu.dot_dimension_numbers<[1], [0], [0], [1], [0, 0, 1, 1], [], []>} : vector<160x32xf32>, vector<32x128xf32>, vector<160x128xf32> -> vector<160x128xf32>
    %c0_21 = arith.constant 0 : index
    %c0_22 = arith.constant 0 : index
    %47 = vector.load %arg8[%c0_21, %c0_22] : memref<160x1xf32, #tpu.memory_space<vmem>>, vector<160x1xf32>
    %48 = vector.broadcast %47 : vector<160x1xf32> to vector<160x128xf32>
    %49 = arith.addf %46, %48 : vector<160x128xf32>
    %50 = vector.extract_strided_slice %49 {offsets = [0, 0], sizes = [32, 128], strides = [1, 1]} : vector<160x128xf32> to vector<32x128xf32>
    %51 = arith.addf %44, %50 : vector<32x128xf32>
    %c0_23 = arith.constant 0 : index
    %c0_24 = arith.constant 0 : index
    %c0_25 = arith.constant 0 : index
    %52 = vector.load %arg9[%c0_23, %c0_24, %c0_25] : memref<5x32x32xf32, #tpu.memory_space<vmem>>, vector<1x32x32xf32>
    %53 = vector.shape_cast %52 : vector<1x32x32xf32> to vector<32x32xf32>
    %cst_26 = arith.constant 0.000000e+00 : f32
    %54 = vector.broadcast %cst_26 : f32 to vector<32x128xf32>
    %55 = arith.maximumf %51, %54 : vector<32x128xf32>
    %cst_27 = arith.constant dense<0.000000e+00> : vector<32x128xf32>
    %56 = tpu.matmul %53, %55, %cst_27 {dimension_numbers = #tpu.dot_dimension_numbers<[1], [0], [0], [1], [0, 0, 1, 1], [], []>} : vector<32x32xf32>, vector<32x128xf32>, vector<32x128xf32> -> vector<32x128xf32>
    %c0_28 = arith.constant 0 : index
    %c0_29 = arith.constant 0 : index
    %c0_30 = arith.constant 0 : index
    %57 = vector.load %arg10[%c0_28, %c0_29, %c0_30] : memref<5x32x1xf32, #tpu.memory_space<vmem>>, vector<1x32x1xf32>
    %58 = vector.shape_cast %57 : vector<1x32x1xf32> to vector<32x1xf32>
    %59 = vector.broadcast %58 : vector<32x1xf32> to vector<32x128xf32>
    %60 = arith.addf %56, %59 : vector<32x128xf32>
    %c0_31 = arith.constant 0 : index
    %c0_32 = arith.constant 0 : index
    %c0_33 = arith.constant 0 : index
    %61 = vector.load %arg11[%c0_31, %c0_32, %c0_33] : memref<5x32x32xf32, #tpu.memory_space<vmem>>, vector<1x32x32xf32>
    %62 = vector.shape_cast %61 : vector<1x32x32xf32> to vector<32x32xf32>
    %cst_34 = arith.constant 0.000000e+00 : f32
    %63 = vector.broadcast %cst_34 : f32 to vector<32x128xf32>
    %64 = arith.maximumf %60, %63 : vector<32x128xf32>
    %cst_35 = arith.constant dense<0.000000e+00> : vector<32x128xf32>
    %65 = tpu.matmul %62, %64, %cst_35 {dimension_numbers = #tpu.dot_dimension_numbers<[1], [0], [0], [1], [0, 0, 1, 1], [], []>} : vector<32x32xf32>, vector<32x128xf32>, vector<32x128xf32> -> vector<32x128xf32>
    %c0_36 = arith.constant 0 : index
    %c0_37 = arith.constant 0 : index
    %c0_38 = arith.constant 0 : index
    %66 = vector.load %arg12[%c0_36, %c0_37, %c0_38] : memref<5x32x1xf32, #tpu.memory_space<vmem>>, vector<1x32x1xf32>
    %67 = vector.shape_cast %66 : vector<1x32x1xf32> to vector<32x1xf32>
    %68 = vector.broadcast %67 : vector<32x1xf32> to vector<32x128xf32>
    %69 = arith.addf %65, %68 : vector<32x128xf32>
    %70 = arith.addf %51, %69 : vector<32x128xf32>
    %71 = vector.extract_strided_slice %49 {offsets = [32, 0], sizes = [32, 128], strides = [1, 1]} : vector<160x128xf32> to vector<32x128xf32>
    %72 = arith.addf %70, %71 : vector<32x128xf32>
    %c1 = arith.constant 1 : index
    %c0_39 = arith.constant 0 : index
    %c0_40 = arith.constant 0 : index
    %73 = vector.load %arg9[%c1, %c0_39, %c0_40] : memref<5x32x32xf32, #tpu.memory_space<vmem>>, vector<1x32x32xf32>
    %74 = vector.shape_cast %73 : vector<1x32x32xf32> to vector<32x32xf32>
    %cst_41 = arith.constant 0.000000e+00 : f32
    %75 = vector.broadcast %cst_41 : f32 to vector<32x128xf32>
    %76 = arith.maximumf %72, %75 : vector<32x128xf32>
    %cst_42 = arith.constant dense<0.000000e+00> : vector<32x128xf32>
    %77 = tpu.matmul %74, %76, %cst_42 {dimension_numbers = #tpu.dot_dimension_numbers<[1], [0], [0], [1], [0, 0, 1, 1], [], []>} : vector<32x32xf32>, vector<32x128xf32>, vector<32x128xf32> -> vector<32x128xf32>
    %c1_43 = arith.constant 1 : index
    %c0_44 = arith.constant 0 : index
    %c0_45 = arith.constant 0 : index
    %78 = vector.load %arg10[%c1_43, %c0_44, %c0_45] : memref<5x32x1xf32, #tpu.memory_space<vmem>>, vector<1x32x1xf32>
    %79 = vector.shape_cast %78 : vector<1x32x1xf32> to vector<32x1xf32>
    %80 = vector.broadcast %79 : vector<32x1xf32> to vector<32x128xf32>
    %81 = arith.addf %77, %80 : vector<32x128xf32>
    %c1_46 = arith.constant 1 : index
    %c0_47 = arith.constant 0 : index
    %c0_48 = arith.constant 0 : index
    %82 = vector.load %arg11[%c1_46, %c0_47, %c0_48] : memref<5x32x32xf32, #tpu.memory_space<vmem>>, vector<1x32x32xf32>
    %83 = vector.shape_cast %82 : vector<1x32x32xf32> to vector<32x32xf32>
    %cst_49 = arith.constant 0.000000e+00 : f32
    %84 = vector.broadcast %cst_49 : f32 to vector<32x128xf32>
    %85 = arith.maximumf %81, %84 : vector<32x128xf32>
    %cst_50 = arith.constant dense<0.000000e+00> : vector<32x128xf32>
    %86 = tpu.matmul %83, %85, %cst_50 {dimension_numbers = #tpu.dot_dimension_numbers<[1], [0], [0], [1], [0, 0, 1, 1], [], []>} : vector<32x32xf32>, vector<32x128xf32>, vector<32x128xf32> -> vector<32x128xf32>
    %c1_51 = arith.constant 1 : index
    %c0_52 = arith.constant 0 : index
    %c0_53 = arith.constant 0 : index
    %87 = vector.load %arg12[%c1_51, %c0_52, %c0_53] : memref<5x32x1xf32, #tpu.memory_space<vmem>>, vector<1x32x1xf32>
    %88 = vector.shape_cast %87 : vector<1x32x1xf32> to vector<32x1xf32>
    %89 = vector.broadcast %88 : vector<32x1xf32> to vector<32x128xf32>
    %90 = arith.addf %86, %89 : vector<32x128xf32>
    %91 = arith.addf %72, %90 : vector<32x128xf32>
    %92 = vector.extract_strided_slice %49 {offsets = [64, 0], sizes = [32, 128], strides = [1, 1]} : vector<160x128xf32> to vector<32x128xf32>
    %93 = arith.addf %91, %92 : vector<32x128xf32>
    %c2 = arith.constant 2 : index
    %c0_54 = arith.constant 0 : index
    %c0_55 = arith.constant 0 : index
    %94 = vector.load %arg9[%c2, %c0_54, %c0_55] : memref<5x32x32xf32, #tpu.memory_space<vmem>>, vector<1x32x32xf32>
    %95 = vector.shape_cast %94 : vector<1x32x32xf32> to vector<32x32xf32>
    %cst_56 = arith.constant 0.000000e+00 : f32
    %96 = vector.broadcast %cst_56 : f32 to vector<32x128xf32>
    %97 = arith.maximumf %93, %96 : vector<32x128xf32>
    %cst_57 = arith.constant dense<0.000000e+00> : vector<32x128xf32>
    %98 = tpu.matmul %95, %97, %cst_57 {dimension_numbers = #tpu.dot_dimension_numbers<[1], [0], [0], [1], [0, 0, 1, 1], [], []>} : vector<32x32xf32>, vector<32x128xf32>, vector<32x128xf32> -> vector<32x128xf32>
    %c2_58 = arith.constant 2 : index
    %c0_59 = arith.constant 0 : index
    %c0_60 = arith.constant 0 : index
    %99 = vector.load %arg10[%c2_58, %c0_59, %c0_60] : memref<5x32x1xf32, #tpu.memory_space<vmem>>, vector<1x32x1xf32>
    %100 = vector.shape_cast %99 : vector<1x32x1xf32> to vector<32x1xf32>
    %101 = vector.broadcast %100 : vector<32x1xf32> to vector<32x128xf32>
    %102 = arith.addf %98, %101 : vector<32x128xf32>
    %c2_61 = arith.constant 2 : index
    %c0_62 = arith.constant 0 : index
    %c0_63 = arith.constant 0 : index
    %103 = vector.load %arg11[%c2_61, %c0_62, %c0_63] : memref<5x32x32xf32, #tpu.memory_space<vmem>>, vector<1x32x32xf32>
    %104 = vector.shape_cast %103 : vector<1x32x32xf32> to vector<32x32xf32>
    %cst_64 = arith.constant 0.000000e+00 : f32
    %105 = vector.broadcast %cst_64 : f32 to vector<32x128xf32>
    %106 = arith.maximumf %102, %105 : vector<32x128xf32>
    %cst_65 = arith.constant dense<0.000000e+00> : vector<32x128xf32>
    %107 = tpu.matmul %104, %106, %cst_65 {dimension_numbers = #tpu.dot_dimension_numbers<[1], [0], [0], [1], [0, 0, 1, 1], [], []>} : vector<32x32xf32>, vector<32x128xf32>, vector<32x128xf32> -> vector<32x128xf32>
    %c2_66 = arith.constant 2 : index
    %c0_67 = arith.constant 0 : index
    %c0_68 = arith.constant 0 : index
    %108 = vector.load %arg12[%c2_66, %c0_67, %c0_68] : memref<5x32x1xf32, #tpu.memory_space<vmem>>, vector<1x32x1xf32>
    %109 = vector.shape_cast %108 : vector<1x32x1xf32> to vector<32x1xf32>
    %110 = vector.broadcast %109 : vector<32x1xf32> to vector<32x128xf32>
    %111 = arith.addf %107, %110 : vector<32x128xf32>
    %112 = arith.addf %93, %111 : vector<32x128xf32>
    %113 = vector.extract_strided_slice %49 {offsets = [96, 0], sizes = [32, 128], strides = [1, 1]} : vector<160x128xf32> to vector<32x128xf32>
    %114 = arith.addf %112, %113 : vector<32x128xf32>
    %c3 = arith.constant 3 : index
    %c0_69 = arith.constant 0 : index
    %c0_70 = arith.constant 0 : index
    %115 = vector.load %arg9[%c3, %c0_69, %c0_70] : memref<5x32x32xf32, #tpu.memory_space<vmem>>, vector<1x32x32xf32>
    %116 = vector.shape_cast %115 : vector<1x32x32xf32> to vector<32x32xf32>
    %cst_71 = arith.constant 0.000000e+00 : f32
    %117 = vector.broadcast %cst_71 : f32 to vector<32x128xf32>
    %118 = arith.maximumf %114, %117 : vector<32x128xf32>
    %cst_72 = arith.constant dense<0.000000e+00> : vector<32x128xf32>
    %119 = tpu.matmul %116, %118, %cst_72 {dimension_numbers = #tpu.dot_dimension_numbers<[1], [0], [0], [1], [0, 0, 1, 1], [], []>} : vector<32x32xf32>, vector<32x128xf32>, vector<32x128xf32> -> vector<32x128xf32>
    %c3_73 = arith.constant 3 : index
    %c0_74 = arith.constant 0 : index
    %c0_75 = arith.constant 0 : index
    %120 = vector.load %arg10[%c3_73, %c0_74, %c0_75] : memref<5x32x1xf32, #tpu.memory_space<vmem>>, vector<1x32x1xf32>
    %121 = vector.shape_cast %120 : vector<1x32x1xf32> to vector<32x1xf32>
    %122 = vector.broadcast %121 : vector<32x1xf32> to vector<32x128xf32>
    %123 = arith.addf %119, %122 : vector<32x128xf32>
    %c3_76 = arith.constant 3 : index
    %c0_77 = arith.constant 0 : index
    %c0_78 = arith.constant 0 : index
    %124 = vector.load %arg11[%c3_76, %c0_77, %c0_78] : memref<5x32x32xf32, #tpu.memory_space<vmem>>, vector<1x32x32xf32>
    %125 = vector.shape_cast %124 : vector<1x32x32xf32> to vector<32x32xf32>
    %cst_79 = arith.constant 0.000000e+00 : f32
    %126 = vector.broadcast %cst_79 : f32 to vector<32x128xf32>
    %127 = arith.maximumf %123, %126 : vector<32x128xf32>
    %cst_80 = arith.constant dense<0.000000e+00> : vector<32x128xf32>
    %128 = tpu.matmul %125, %127, %cst_80 {dimension_numbers = #tpu.dot_dimension_numbers<[1], [0], [0], [1], [0, 0, 1, 1], [], []>} : vector<32x32xf32>, vector<32x128xf32>, vector<32x128xf32> -> vector<32x128xf32>
    %c3_81 = arith.constant 3 : index
    %c0_82 = arith.constant 0 : index
    %c0_83 = arith.constant 0 : index
    %129 = vector.load %arg12[%c3_81, %c0_82, %c0_83] : memref<5x32x1xf32, #tpu.memory_space<vmem>>, vector<1x32x1xf32>
    %130 = vector.shape_cast %129 : vector<1x32x1xf32> to vector<32x1xf32>
    %131 = vector.broadcast %130 : vector<32x1xf32> to vector<32x128xf32>
    %132 = arith.addf %128, %131 : vector<32x128xf32>
    %133 = arith.addf %114, %132 : vector<32x128xf32>
    %134 = vector.extract_strided_slice %49 {offsets = [128, 0], sizes = [32, 128], strides = [1, 1]} : vector<160x128xf32> to vector<32x128xf32>
    %135 = arith.addf %133, %134 : vector<32x128xf32>
    %c4 = arith.constant 4 : index
    %c0_84 = arith.constant 0 : index
    %c0_85 = arith.constant 0 : index
    %136 = vector.load %arg9[%c4, %c0_84, %c0_85] : memref<5x32x32xf32, #tpu.memory_space<vmem>>, vector<1x32x32xf32>
    %137 = vector.shape_cast %136 : vector<1x32x32xf32> to vector<32x32xf32>
    %cst_86 = arith.constant 0.000000e+00 : f32
    %138 = vector.broadcast %cst_86 : f32 to vector<32x128xf32>
    %139 = arith.maximumf %135, %138 : vector<32x128xf32>
    %cst_87 = arith.constant dense<0.000000e+00> : vector<32x128xf32>
    %140 = tpu.matmul %137, %139, %cst_87 {dimension_numbers = #tpu.dot_dimension_numbers<[1], [0], [0], [1], [0, 0, 1, 1], [], []>} : vector<32x32xf32>, vector<32x128xf32>, vector<32x128xf32> -> vector<32x128xf32>
    %c4_88 = arith.constant 4 : index
    %c0_89 = arith.constant 0 : index
    %c0_90 = arith.constant 0 : index
    %141 = vector.load %arg10[%c4_88, %c0_89, %c0_90] : memref<5x32x1xf32, #tpu.memory_space<vmem>>, vector<1x32x1xf32>
    %142 = vector.shape_cast %141 : vector<1x32x1xf32> to vector<32x1xf32>
    %143 = vector.broadcast %142 : vector<32x1xf32> to vector<32x128xf32>
    %144 = arith.addf %140, %143 : vector<32x128xf32>
    %c4_91 = arith.constant 4 : index
    %c0_92 = arith.constant 0 : index
    %c0_93 = arith.constant 0 : index
    %145 = vector.load %arg11[%c4_91, %c0_92, %c0_93] : memref<5x32x32xf32, #tpu.memory_space<vmem>>, vector<1x32x32xf32>
    %146 = vector.shape_cast %145 : vector<1x32x32xf32> to vector<32x32xf32>
    %cst_94 = arith.constant 0.000000e+00 : f32
    %147 = vector.broadcast %cst_94 : f32 to vector<32x128xf32>
    %148 = arith.maximumf %144, %147 : vector<32x128xf32>
    %cst_95 = arith.constant dense<0.000000e+00> : vector<32x128xf32>
    %149 = tpu.matmul %146, %148, %cst_95 {dimension_numbers = #tpu.dot_dimension_numbers<[1], [0], [0], [1], [0, 0, 1, 1], [], []>} : vector<32x32xf32>, vector<32x128xf32>, vector<32x128xf32> -> vector<32x128xf32>
    %c4_96 = arith.constant 4 : index
    %c0_97 = arith.constant 0 : index
    %c0_98 = arith.constant 0 : index
    %150 = vector.load %arg12[%c4_96, %c0_97, %c0_98] : memref<5x32x1xf32, #tpu.memory_space<vmem>>, vector<1x32x1xf32>
    %151 = vector.shape_cast %150 : vector<1x32x1xf32> to vector<32x1xf32>
    %152 = vector.broadcast %151 : vector<32x1xf32> to vector<32x128xf32>
    %153 = arith.addf %149, %152 : vector<32x128xf32>
    %154 = arith.addf %135, %153 : vector<32x128xf32>
    %cst_99 = arith.constant 0.000000e+00 : f32
    %155 = vector.broadcast %cst_99 : f32 to vector<32x128xf32>
    %156 = arith.maximumf %154, %155 : vector<32x128xf32>
    %c0_100 = arith.constant 0 : index
    %c0_101 = arith.constant 0 : index
    %157 = vector.load %arg13[%c0_100, %c0_101] : memref<32x1xf32, #tpu.memory_space<vmem>>, vector<32x1xf32>
    %158 = vector.broadcast %157 : vector<32x1xf32> to vector<32x128xf32>
    %159 = arith.mulf %156, %158 : vector<32x128xf32>
    %cst_102 = arith.constant dense<0.000000e+00> : vector<128xf32>
    %160 = vector.multi_reduction <add>, %159, %cst_102 [0] : vector<32x128xf32> to vector<128xf32>
    %161 = vector.shape_cast %160 : vector<128xf32> to vector<1x128xf32>
    %c0_103 = arith.constant 0 : index
    %c0_104 = arith.constant 0 : index
    %162 = vector.load %arg14[%c0_103, %c0_104] : memref<1x1xf32, #tpu.memory_space<vmem>>, vector<1x1xf32>
    %163 = vector.broadcast %162 : vector<1x1xf32> to vector<1x128xf32>
    %164 = arith.addf %161, %163 : vector<1x128xf32>
    %165 = vector.shape_cast %164 : vector<1x128xf32> to vector<1x1x128xf32>
    %c0_105 = arith.constant 0 : index
    %c0_106 = arith.constant 0 : index
    %c0_107 = arith.constant 0 : index
    %166 = vector.load %arg15[%c0_105, %c0_106, %c0_107] : memref<1x1x128xf32, #tpu.memory_space<vmem>>, vector<1x1x128xf32>
    tpu.vector_store %arg15[%c0_105, %c0_106, %c0_107], %165 {strides = array<i32>} : memref<1x1x128xf32, #tpu.memory_space<vmem>>, vector<1x1x128xf32>,
    return
  }
  func.func @transform_0(%arg0: i32, %arg1: i32) -> (i32, i32, i32) {
    %c0_i32 = arith.constant 0 : i32
    %c0_i32_0 = arith.constant 0 : i32
    return %arg0, %c0_i32, %arg1 : i32, i32, i32
  }
  func.func @transform_1(%arg0: i32, %arg1: i32) -> (i32, i32, i32, i32) {
    %c0_i32 = arith.constant 0 : i32
    %c0_i32_0 = arith.constant 0 : i32
    %c0_i32_1 = arith.constant 0 : i32
    %c0_i32_2 = arith.constant 0 : i32
    return %arg0, %c0_i32, %c0_i32_0, %c0_i32_1 : i32, i32, i32, i32
  }
  func.func @transform_2(%arg0: i32, %arg1: i32) -> (i32, i32, i32, i32) {
    %c0_i32 = arith.constant 0 : i32
    %c0_i32_0 = arith.constant 0 : i32
    %c0_i32_1 = arith.constant 0 : i32
    %c0_i32_2 = arith.constant 0 : i32
    return %arg0, %c0_i32, %c0_i32_0, %c0_i32_1 : i32, i32, i32, i32
  }
  func.func @transform_3(%arg0: i32, %arg1: i32) -> (i32, i32) {
    %c0_i32 = arith.constant 0 : i32
    %c0_i32_0 = arith.constant 0 : i32
    %c0_i32_1 = arith.constant 0 : i32
    return %c0_i32, %c0_i32_0 : i32, i32
  }
  func.func @transform_4(%arg0: i32, %arg1: i32) -> (i32, i32) {
    %c0_i32 = arith.constant 0 : i32
    %c0_i32_0 = arith.constant 0 : i32
    %c0_i32_1 = arith.constant 0 : i32
    return %c0_i32, %c0_i32_0 : i32, i32
  }
  func.func @transform_5(%arg0: i32, %arg1: i32) -> (i32, i32) {
    %c0_i32 = arith.constant 0 : i32
    %c0_i32_0 = arith.constant 0 : i32
    %c0_i32_1 = arith.constant 0 : i32
    return %c0_i32, %c0_i32_0 : i32, i32
  }
  func.func @transform_6(%arg0: i32, %arg1: i32) -> (i32, i32) {
    %c0_i32 = arith.constant 0 : i32
    %c0_i32_0 = arith.constant 0 : i32
    %c0_i32_1 = arith.constant 0 : i32
    return %c0_i32, %c0_i32_0 : i32, i32
  }
  func.func @transform_7(%arg0: i32, %arg1: i32) -> (i32, i32, i32) {
    %c0_i32 = arith.constant 0 : i32
    %c0_i32_0 = arith.constant 0 : i32
    %c0_i32_1 = arith.constant 0 : i32
    %c0_i32_2 = arith.constant 0 : i32
    return %c0_i32, %c0_i32_0, %c0_i32_1 : i32, i32, i32
  }
  func.func @transform_8(%arg0: i32, %arg1: i32) -> (i32, i32, i32) {
    %c0_i32 = arith.constant 0 : i32
    %c0_i32_0 = arith.constant 0 : i32
    %c0_i32_1 = arith.constant 0 : i32
    %c0_i32_2 = arith.constant 0 : i32
    return %c0_i32, %c0_i32_0, %c0_i32_1 : i32, i32, i32
  }
  func.func @transform_9(%arg0: i32, %arg1: i32) -> (i32, i32, i32) {
    %c0_i32 = arith.constant 0 : i32
    %c0_i32_0 = arith.constant 0 : i32
    %c0_i32_1 = arith.constant 0 : i32
    %c0_i32_2 = arith.constant 0 : i32
    return %c0_i32, %c0_i32_0, %c0_i32_1 : i32, i32, i32
  }
  func.func @transform_10(%arg0: i32, %arg1: i32) -> (i32, i32, i32) {
    %c0_i32 = arith.constant 0 : i32
    %c0_i32_0 = arith.constant 0 : i32
    %c0_i32_1 = arith.constant 0 : i32
    %c0_i32_2 = arith.constant 0 : i32
    return %c0_i32, %c0_i32_0, %c0_i32_1 : i32, i32, i32
  }
  func.func @transform_11(%arg0: i32, %arg1: i32) -> (i32, i32) {
    %c0_i32 = arith.constant 0 : i32
    %c0_i32_0 = arith.constant 0 : i32
    %c0_i32_1 = arith.constant 0 : i32
    return %c0_i32, %c0_i32_0 : i32, i32
  }
  func.func @transform_12(%arg0: i32, %arg1: i32) -> (i32, i32) {
    %c0_i32 = arith.constant 0 : i32
    %c0_i32_0 = arith.constant 0 : i32
    %c0_i32_1 = arith.constant 0 : i32
    return %c0_i32, %c0_i32_0 : i32, i32
  }
  func.func @transform_13(%arg0: i32, %arg1: i32) -> (i32, i32, i32) {
    %c0_i32 = arith.constant 0 : i32
    %c0_i32_0 = arith.constant 0 : i32
    return %arg0, %c0_i32, %arg1 : i32, i32, i32
  }
}

</mosaic_0001>

<bundles_post_ra>
// kernel: tpu_custom_call.1
= control target key start
LH: loop header
LB: loop body
LE: loop exit
PB: predicated region body
PF: predicated region fallthrough
CT: control target
= control target key end

     0   :  { %s5639_s0 = inlined_call_operand.vmem [shape: f32[2,3,256], index: 0, kind: input, shape index: {}]   ;;  %s5640_s1 = inlined_call_operand.vmem [shape: f32[2,1,200,3], index: 1, kind: input, shape index: {}]   ;;  %s5641_s2 = inlined_call_operand.vmem [shape: f32[2,1,33,200], index: 2, kind: input, shape index: {}]   ;;  %s5642_s3 = inlined_call_operand.vmem [shape: f32[32,3], index: 3, kind: input, shape index: {}]   ;;  %s5643_s4 = inlined_call_operand.vmem [shape: f32[32,1], index: 4, kind: input, shape index: {}]   ;;  %s5644_s5 = inlined_call_operand.vmem [shape: f32[160,32], index: 5, kind: input, shape index: {}]   ;;  %s5645_s6 = inlined_call_operand.vmem [shape: f32[160,1], index: 6, kind: input, shape index: {}]   ;;  %s5646_s7 = inlined_call_operand.vmem [shape: f32[5,32,32], index: 7, kind: input, shape index: {}]   ;;  %s5647_s8 = inlined_call_operand.vmem [shape: f32[5,32,1], index: 8, kind: input, shape index: {}]   ;;  %s5648_s9 = inlined_call_operand.vmem [shape: f32[5,32,32], index: 9, kind: input, shape index: {}]   ;;  %s5649_s10 = inlined_call_operand.vmem [shape: f32[5,32,1], index: 10, kind: input, shape index: {}]   ;;  %s5650_s11 = inlined_call_operand.vmem [shape: f32[32,1], index: 11, kind: input, shape index: {}]   ;;  %s5651_s12 = inlined_call_operand.<no memory space> [shape: f32[1,1], index: 12, kind: input, shape index: {}]   ;;  %s5652_s13 = inlined_call_operand.hbm [shape: f32[2,1,256], index: 13, kind: output, shape index: {}]  }
   0x1   :  { %5656 = sst [smem:[#allocation10_spill]] %s5639_s0  ;;  %v18_v0 = vstv %s5651_s12 }
   0x2   :  { %5657 = sst [smem:[#allocation11_spill]] %s5640_s1  ;;  %19 = vst [vmem:[#allocation3] sm:$0x1] %v18_v0 }
   0x3   :  { %5658 = sst [smem:[#allocation12_spill]] %s5641_s2 }
   0x4   :  { %20 = vsyncpa [#allocation5], 0 }
   0x5   :  { %22 = vsyncpa [#allocation5 + $0x1], 0  ;;  %s4347_s27 = smov 0   ;;  %s4349_s28 = smov 0  }
   0x6   :  { %s4351_s29 = smov 0   ;;  %s4353_s30 = smov 0  }
   0x7   :  { %s4355_s14 = smov 0   ;;  %s4357_s15 = smov 0  }
   0x8   :  { %s4359_s16 = smov 0   ;;  %s4361_s17 = smov 0  }
   0x9 LB: > { %5659 = sst [smem:[#allocation7_spill]] %s4263_s16  ;;  %s3502_s12 = sadd.s32 4294967295, %s4267_s17   ;;  %s4267_s17 = sphi %s4361_s17, %s28_s17   ;;  %s4263_s16 = sphi %s4359_s16, %s5669_s16   ;;  %s4259_s15 = sphi %s4357_s15, %s5674_s15   ;;  %s4255_s14 = sphi %s4355_s14, %s5667_s14   ;;  %s4251_s30 = sphi %s4353_s30, %s5673_s30   ;;  %s4247_s29 = sphi %s4351_s29, %s5672_s29   ;;  %s4243_s28 = sphi %s4349_s28, %s5671_s28   ;;  %s4239_s27 = sphi %s4347_s27, %s5670_s27  }
   0xa   : > { %s3503_s18 = sadd.s32 4294967294, %s4267_s17   ;;  %s37_s19 = sadd.s32 1, %s4259_s15 }
   0xb   : > { %p38_p0 = scmp.ge.s32.totalorder %s37_s19, 2  ;;  %s40_s20 = sadd.s32 1, %s4263_s16 }
   0xc   : > { %p349_p1 = scmp.ne.s32.totalorder %s4247_s29, %s4243_s28  ;;  %p350_p2 = scmp.eq.s32.totalorder %s3502_s12, 3 }
   0xd   : > { %s5676_s19 = smov (%p38_p0, %s37_s19), 0  ;;  %s5678_s20 = smov (!%p38_p0, %s40_s20), %s4263_s16 }
   0xe   : > { %5660 = sst [smem:[#allocation8_spill]] %s5676_s19  ;;  %s335_s21 = ssub.s32 %s4259_s15, %s5676_s19 }
   0xf   : > { %p4398_p3 = por %p350_p2, %p349_p1  ;;  %p42_p4 = scmp.ge.s32.totalorder %s5678_s20, 2 }
  0x10   : > { %p355_p5 = scmp.ne.s32.totalorder %s4243_s28, %s4239_s27  ;;  %p356_p6 = scmp.eq.s32.totalorder %s3503_s18, 3 }
  0x11   : > { %p3506_p7 = scmp.ge.s32.totalorder %s4267_s17, 1  ;;  %s5680_s20 = smov (%p42_p4, %s5678_s20), 0 }
  0x12   : > { %5662 = sst [smem:[#allocation9_spill]] %s5680_s20  ;;  %p4407_p8 = por %p356_p6, %p355_p5 }
  0x13   : > { %p431_p9 = scmp.lt.s32.totalorder %s4267_s17, 5  ;;  %s334_s24 = ssub.s32 %s4263_s16, %s5680_s20 }
  0x14   : > { %s339_s25 = sadd.s32 1, %s4247_s29  ;;  %s336_s26 = sor.u32 %s335_s21, %s334_s24 }
  0x15   : > { %p432_p10 = pnand %p3506_p7, %p431_p9  ;;  %p337_p11 = scmp.eq.s32.totalorder %s336_s26, 0 }
  0x16   : > { %p487_p12 = scmp.lt.s32.totalorder (!%p432_p10), %s4255_s14, 1  ;;  %s5664_s1 = sld [smem:[#allocation11_spill]] (!%p432_p10) }
  0x17   : > { %s4416_s12 = scalar_select %p337_p11, %s4247_s29, %s339_s25  }
  0x18   : > { %435 = sbr.rel (%p432_p10) target bundleno = 3007 (0xbbf), region = 72  ;;  %p489_p13 = scmp.lt.s32.totalorder (!%p432_p10), %s4251_s30, 1 }
  0x19   : > { %s5665_s0 = sld [smem:[#allocation10_spill]] (!%p432_p10)  ;;  %s485_s21 = sand.u32 (!%p432_p10), 1, %s4243_s28  }
  0x1a   : > { %s5666_s2 = sld [smem:[#allocation12_spill]] (!%p432_p10) }
  0x1d   : > { %v4269_v1 = vmov 2   ;;  %v4270_v2 = vmov 0   ;;  %s4422_s18 = scalar_select %p487_p12, %s4255_s14, 1  ;;  %v4271_v6 = vmov 1   ;;  %v4272_v26 = vmov 0.0  }
  0x1e   : > { %4027 = vset.pattern.permute.xlu0 %v4269_v1  ;;  %4021 = vset.pattern.permute.xlu1 %v4270_v2  ;;  %s490_s19 = scalar_select %p489_p13, %s4251_s30, 1  ;;  %v666_v39 = vlaneseq }
  0x1f   : > { %s3944_s20 = smul.u32 200, %s4422_s18  ;;  %1394 = vmatprep.subr.mxu0 %v4272_v26 }
  0x20   : > { %v667_v42 = vshrl.u32 %v666_v39, 7 }
  0x21   : > { %s4428_s24 = scalar_lea.vmem %s5664_s1, %s3944_s20  ;;  %s3507_s20 = sshll.u32 %s4422_s18, 1 }
  0x22   : > { %v520_v3 = vld [vmem:[%s4428_s24 + $0x70] sm:$0xff]  ;;  %v4432_v4 = vld [vmem:[%s4428_s24 + $0x68] sm:$0xff]  ;;  %v4436_v5 = vld [vmem:[%s4428_s24 + $0x60] sm:$0xff]  ;;  %s492_s25 = sadd.s32 %s3507_s20, %s490_s19  ;;  %v822_v44 = vsub.s32 1, %v667_v42  ;;  %v4580_v46 = vsub.s32 0, %v667_v42  ;;  %v1001_v48 = vsub.s32 2, %v667_v42 }
  0x23   : > { %613 = vperm.xlu1 %4021, %v520_v3   ;;  %952 = vperm.xlu0 %4027, %v4432_v4   ;;  %v4441_v7 = vld [vmem:[%s4428_s24 + $0x40] sm:$0xff]  ;;  %v521_v8 = vld [vmem:[%s4428_s24 + $0x78] sm:$0xff]  ;;  %v4457_v11 = vld [vmem:[%s4428_s24 + $0x10] sm:$0xff]  ;;  %s3508_s26 = sshll.u32 %s492_s25, 2  ;;  %s3945_s1 = smul.u32 80, %s4422_s18 }
  0x24   : > { %v4447_v9 = vld [vmem:[%s4428_s24 + $0x38] sm:$0xff]  ;;  %v4468_v13 = vld [vmem:[%s4428_s24 + $0xb0] sm:$0xff]  ;;  %v515_v16 = vld [vmem:[%s4428_s24 + $0x48] sm:$0xff]  ;;  %s4578_s16 = scalar_lea.vmem %s5665_s0, %s3508_s26  ;;  %s486_s19 = scalar_lea.vmem [#allocation4], %s485_s21 }
  0x25   : > { %v4451_v10 = vld [vmem:[%s4428_s24 + $0x18] sm:$0xff]  ;;  %v516_v15 = vld [vmem:[%s4428_s24 + $0x50] sm:$0xff]  ;;  %v511_v17 = vld [vmem:[%s4428_s24 + $0x28] sm:$0xff]  ;;  %s4876_s20 = scalar_lea.vmem %s5666_s2, %s3945_s1  ;;  %s3645_s1 = sshll.u32 %s4255_s14, 1 }
  0x26   : > { %v4462_v12 = vld [vmem:[%s4428_s24 + $0xb8] sm:$0xff]  ;;  %v510_v18 = vld [vmem:[%s4428_s24 + $0x20] sm:$0xff]  ;;  %v512_v23 = vld [vmem:[%s4428_s24 + $0x30] sm:$0xff]  ;;  %s3404_s2 = sshll.u32 %s486_s19, 4  ;;  %s3390_s14 = scalar_lea.sflag [#allocation5], %s485_s21  ;;  %s3405_s2 = int_to_ptr.vmem [resolvable:$true] %s3404_s2 }
  0x27   : > { %4022 = vset.pattern.permute.xlu1 %v4271_v6  ;;  %948 = vperm.xlu0 %4027, %v4436_v5   ;;  %v517_v14 = vld [vmem:[%s4428_s24 + $0x58] sm:$0xff]  ;;  %v4483_v19 = vld [vmem:[%s4428_s24] sm:$0xff]  ;;  %v4521_v24 = vld [vmem:[%s4428_s24 + $0x90] sm:$0xff]  ;;  %s4175_s25 = scalar_lea.vmem %s3405_s2, 16 }
  0x28   : > { %777 = vperm.xlu1 %4022, %v520_v3   ;;  %v4488_v20 = vld [vmem:[%s4428_s24 + $0xc0] sm:$0xff]  ;;  %v4498_v22 = vld [vmem:[%s4428_s24 + $0x98] sm:$0xff]  ;;  %v4527_v25 = vld [vmem:[%s4428_s24 + $0x88] sm:$0xff]  ;;  %p4176_p0 = scmp.ne.s32.totalorder %s3405_s2, %s4175_s25 }
  0x29   : > { %v4492_v21 = vld [vmem:[%s4428_s24 + $0xa0] sm:$0xff]  ;;  %v507_v27 = vld [vmem:[%s4428_s24 + $0x8] sm:$0xff] }
  0x2a   : > { %v505_v47 = vld [vmem:[%s4578_s16] sm:$0x7]  ;;  %v527_v58 = vld [vmem:[%s4428_s24 + $0xa8] sm:$0xff]  ;;  %p4177_p1 = pnand %p4176_p0, %p4398_p3 }
  0x2b   : > { %932 = vperm.xlu0 %4027, %v4441_v7   ;;  %v4585_v49 = vrot.slane %v505_v47, %v822_v44  ;;  %v4590_v51 = vrot.slane %v505_v47, %v4580_v46  ;;  %v4593_v53 = vrot.slane %v505_v47, %v1001_v48 }
  0x2c   : > { %4023 = vset.pattern.permute.xlu1 %v4269_v1  ;;  %p4178_p2 = pneg %p4177_p1 }
  0x2d   : > { %960 = vperm.xlu1 %4023, %v521_v8  }
  0x2f   : > { %928 = vperm.xlu0 %4027, %v4447_v9  }
  0x31   : > { %4024 = vset.pattern.permute.xlu1 %v4271_v6 }
  0x32   : > { %773 = vperm.xlu1 %4024, %v4432_v4  }
  0x33   : > { %912 = vperm.xlu0 %4027, %v4451_v10  }
  0x36   : > { %4025 = vset.pattern.permute.xlu1 %v4269_v1 }
  0x37   : > { %956 = vperm.xlu1 %4025, %v520_v3   ;;  %908 = vperm.xlu0 %4027, %v4457_v11  }
  0x3b   : > { %4026 = vset.pattern.permute.xlu1 %v4271_v6  ;;  %992 = vperm.xlu0 %4027, %v4462_v12  }
  0x3c   : > { %769 = vperm.xlu1 %4026, %v4436_v5  }
  0x3f   : > { %988 = vperm.xlu0 %4027, %v4468_v13  }
  0x40   : > { %4028 = vset.pattern.permute.xlu1 %v4270_v2 }
  0x41   : > { %598 = vperm.xlu1 %4028, %v517_v14  }
  0x43   : > { %4057 = vset.pattern.permute.xlu0 %v4271_v6 }
  0x44   : > { %781 = vperm.xlu0 %4057, %v521_v8  }
  0x45   : > { %4029 = vset.pattern.permute.xlu1 %v4271_v6 }
  0x46   : > { %765 = vperm.xlu1 %4029, %v517_v14  }
  0x48   : > { %761 = vperm.xlu0 %4057, %v516_v15  }
  0x4a   : > { %4030 = vset.pattern.permute.xlu1 %v4270_v2 }
  0x4b   : > { %593 = vperm.xlu1 %4030, %v516_v15  }
  0x4c   : > { %757 = vperm.xlu0 %4057, %v515_v16  }
  0x4f   : > { %4031 = vset.pattern.permute.xlu1 %v4269_v1 }
  0x50   : > { %944 = vperm.xlu1 %4031, %v517_v14   ;;  %741 = vperm.xlu0 %4057, %v511_v17  }
  0x54   : > { %4032 = vset.pattern.permute.xlu1 %v4270_v2  ;;  %737 = vperm.xlu0 %4057, %v510_v18  }
  0x55   : > { %588 = vperm.xlu1 %4032, %v515_v16  }
  0x58   : > { %721 = vperm.xlu0 %4057, %v4483_v19  }
  0x59   : > { %4033 = vset.pattern.permute.xlu1 %v4269_v1 }
  0x5a   : > { %940 = vperm.xlu1 %4033, %v516_v15  }
  0x5c   : > { %817 = vperm.xlu0 %4057, %v4488_v20  }
  0x5e   : > { %4034 = vset.pattern.permute.xlu1 %v4271_v6 }
  0x5f   : > { %753 = vperm.xlu1 %4034, %v4441_v7  }
  0x60   : > { %801 = vperm.xlu0 %4057, %v4492_v21  }
  0x63   : > { %4035 = vset.pattern.permute.xlu1 %v4269_v1 }
  0x64   : > { %936 = vperm.xlu1 %4035, %v515_v16   ;;  %797 = vperm.xlu0 %4057, %v4498_v22  }
  0x68   : > { %4036 = vset.pattern.permute.xlu1 %v4271_v6  ;;  %4061 = vset.pattern.permute.xlu0 %v4270_v2 }
  0x69   : > { %749 = vperm.xlu1 %4036, %v4447_v9   ;;  %618 = vperm.xlu0 %4061, %v521_v8  }
  0x6d   : > { %4037 = vset.pattern.permute.xlu1 %v4270_v2  ;;  %608 = vperm.xlu0 %4061, %v4432_v4  }
  0x6e   : > { %573 = vperm.xlu1 %4037, %v512_v23  }
  0x71   : > { %603 = vperm.xlu0 %4061, %v4436_v5  }
  0x72   : > { %4038 = vset.pattern.permute.xlu1 %v4271_v6 }
  0x73   : > { %745 = vperm.xlu1 %4038, %v512_v23  }
  0x75   : > { %583 = vperm.xlu0 %4061, %v4441_v7  }
  0x77   : > { %4039 = vset.pattern.permute.xlu1 %v4270_v2 }
  0x78   : > { %568 = vperm.xlu1 %4039, %v511_v17  }
  0x79   : > { %578 = vperm.xlu0 %4061, %v4447_v9  }
  0x7c   : > { %4040 = vset.pattern.permute.xlu1 %v4269_v1 }
  0x7d   : > { %924 = vperm.xlu1 %4040, %v512_v23   ;;  %558 = vperm.xlu0 %4061, %v4451_v10  }
  0x81   : > { %4041 = vset.pattern.permute.xlu1 %v4270_v2  ;;  %553 = vperm.xlu0 %4061, %v4457_v11  }
  0x82   : > { %563 = vperm.xlu1 %4041, %v510_v18  }
  0x85   : > { %658 = vperm.xlu0 %4061, %v4462_v12  }
  0x86   : > { %4042 = vset.pattern.permute.xlu1 %v4269_v1 }
  0x87   : > { %920 = vperm.xlu1 %4042, %v511_v17  }
  0x89   : > { %653 = vperm.xlu0 %4061, %v4468_v13  }
  0x8b   : > { %4043 = vset.pattern.permute.xlu1 %v4271_v6 }
  0x8c   : > { %733 = vperm.xlu1 %4043, %v4451_v10  }
  0x8d   : > { %633 = vperm.xlu0 %4061, %v4521_v24  }
  0x90   : > { %4044 = vset.pattern.permute.xlu1 %v4269_v1 }
  0x91   : > { %916 = vperm.xlu1 %4044, %v510_v18   ;;  %628 = vperm.xlu0 %4061, %v4527_v25  }
  0x95   : > { %4045 = vset.pattern.permute.xlu1 %v4271_v6  ;;  %4066 = vset.pattern.permute.xlu0 %v4269_v1 }
  0x96   : > { %729 = vperm.xlu1 %4045, %v4457_v11   ;;  %972 = vperm.xlu0 %4066, %v4521_v24  }
  0x9a   : > { %4046 = vset.pattern.permute.xlu1 %v4270_v2  ;;  %968 = vperm.xlu0 %4066, %v4527_v25  }
  0x9b   : > { %548 = vperm.xlu1 %4046, %v507_v27  }
  0x9e   : > { %v614_v28 = vpop.permute.xlu1 %613  ;;  %v4539_v29 = vpop.permute.xlu0 %952  ;;  %4070 = vset.pattern.permute.xlu0 %v4270_v2 }
  0x9f   : > { %4047 = vset.pattern.permute.xlu1 %v4271_v6  ;;  %v684_v56 = vsub.f32 %v614_v28, %v4590_v51 }
  0xa0   : > { %725 = vperm.xlu1 %4047, %v507_v27  }
  0xa1   : > { %v709_v62 = vmul.f32 %v684_v56, %v684_v56 }
  0xa2   : > { %v4543_v30 = vpop.permute.xlu0 %948 }
  0xa3   : > { %v778_v31 = vpop.permute.xlu1 %777 }
  0xa4   : > { %4048 = vset.pattern.permute.xlu1 %v4270_v2  ;;  %v838_v54 = vsub.f32 %v778_v31, %v4585_v49 }
  0xa5   : > { %543 = vperm.xlu1 %4048, %v4483_v19  }
  0xa6   : > { %v4547_v32 = vpop.permute.xlu0 %932  ;;  %v863_v60 = vmul.f32 %v838_v54, %v838_v54 }
  0xa8   : > { %v4549_v33 = vpop.permute.xlu1 %960  ;;  %v888_v3 = vadd.f32 %v863_v60, %v709_v62 }
  0xa9   : > { %4049 = vset.pattern.permute.xlu1 %v4269_v1 }
  0xaa   : > { %904 = vperm.xlu1 %4049, %v507_v27   ;;  %v4552_v34 = vpop.permute.xlu0 %928 }
  0xad   : > { %v4555_v35 = vpop.permute.xlu1 %773 }
  0xae   : > { %4050 = vset.pattern.permute.xlu1 %v4270_v2  ;;  %v4558_v36 = vpop.permute.xlu0 %912 }
  0xaf   : > { %663 = vperm.xlu1 %4050, %v4488_v20  }
  0xb2   : > { %v957_v37 = vpop.permute.xlu1 %956  ;;  %v4563_v38 = vpop.permute.xlu0 %908 }
  0xb3   : > { %4051 = vset.pattern.permute.xlu1 %v4269_v1  ;;  %v1017_v57 = vsub.f32 %v957_v37, %v4593_v53 }
  0xb4   : > { %900 = vperm.xlu1 %4051, %v4483_v19  }
  0xb5   : > { %v1042_v63 = vmul.f32 %v1017_v57, %v1017_v57 }
  0xb6   : > { %v4567_v40 = vpop.permute.xlu0 %992 }
  0xb7   : > { %v4569_v41 = vpop.permute.xlu1 %769  ;;  %v4607_v9 = vadd.f32 %v1042_v63, %v888_v3 }
  0xb8   : > { %4052 = vset.pattern.permute.xlu1 %v4271_v6 }
  0xb9   : > { %813 = vperm.xlu1 %4052, %v4462_v12   ;;  %4072 = vrsqrt.f32 %v4607_v9  ;;  %vm1178_vm0 = vcmp.eq.f32.partialorder %v4607_v9, inf  ;;  %vm1180_vm1 = vcmp.eq.f32.partialorder %v4607_v9, 0.0 }
  0xba   : > { %v4573_v43 = vpop.permute.xlu0 %988 }
  0xbc   : > { %v599_v45 = vpop.permute.xlu1 %598 }
  0xbd   : > { %4053 = vset.pattern.permute.xlu1 %v4269_v1  ;;  %v681_v7 = vsub.f32 %v599_v45, %v4590_v51 }
  0xbe   : > { %996 = vperm.xlu1 %4053, %v4488_v20  }
  0xbf   : > { %v4587_v50 = vpop.permute.xlu0 %781  ;;  %v706_v12 = vmul.f32 %v681_v7, %v681_v7  ;;  %v1018_v7 = vsub.f32 %v4549_v33, %v4593_v53 }
  0xc0   : > { %v839_v60 = vsub.f32 %v4587_v50, %v4585_v49 }
  0xc1   : > { %v766_v52 = vpop.permute.xlu1 %765 }
  0xc2   : > { %4054 = vset.pattern.permute.xlu1 %v4271_v6  ;;  %v835_v0 = vsub.f32 %v766_v52, %v4585_v49 }
  0xc3   : > { %809 = vperm.xlu1 %4054, %v4468_v13   ;;  %v762_v55 = vpop.permute.xlu0 %761 }
  0xc4   : > { %v860_v10 = vmul.f32 %v835_v0, %v835_v0  ;;  %v834_v16 = vsub.f32 %v762_v55, %v4585_v49 }
  0xc6   : > { %v594_v59 = vpop.permute.xlu1 %593  ;;  %v885_v15 = vadd.f32 %v860_v10, %v706_v12  ;;  %v859_v23 = vmul.f32 %v834_v16, %v834_v16  ;;  %v4073_v52 = vpop.eup %4072  ;;  %v864_v10 = vmul.f32 %v839_v60, %v839_v60  ;;  %v837_v12 = vsub.f32 %v4555_v35, %v4585_v49 }
  0xc7   : > { %4055 = vset.pattern.permute.xlu1 %v4270_v2  ;;  %v758_v61 = vpop.permute.xlu0 %757  ;;  %v680_v17 = vsub.f32 %v594_v59, %v4590_v51  ;;  %v1177_v59 = vmul.f32 %v4073_v52, %v4607_v9 }
  0xc8   : > { %648 = vperm.xlu1 %4055, %v527_v58   ;;  %v833_v42 = vsub.f32 %v758_v61, %v4585_v49 }
  0xc9   : > { %v705_v27 = vmul.f32 %v680_v17, %v680_v17  ;;  %v1043_v17 = vmul.f32 %v1018_v7, %v1018_v7 }
  0xca   : > { %v858_v54 = vmul.f32 %v833_v42, %v833_v42  ;;  %v1011_v42 = vsub.f32 %v4547_v32, %v4593_v53  ;;  %v1006_v32 = vsub.f32 %v4558_v36, %v4593_v53 }
  0xcb   : > { %v945_v4 = vpop.permute.xlu1 %944  ;;  %v4602_v5 = vpop.permute.xlu0 %741  ;;  %v884_v39 = vadd.f32 %v859_v23, %v705_v27  ;;  %v1015_v27 = vsub.f32 %v4543_v30, %v4593_v53  ;;  %v836_v30 = vsub.f32 %v4569_v41, %v4585_v49 }
  0xcc   : > { %v1014_v8 = vsub.f32 %v945_v4, %v4593_v53  ;;  %4056 = vset.pattern.permute.xlu1 %v4271_v6  ;;  %v1036_v36 = vmul.f32 %v1011_v42, %v1011_v42 }
  0xcd   : > { %805 = vperm.xlu1 %4056, %v527_v58  }
  0xce   : > { %v1039_v13 = vmul.f32 %v1014_v8, %v1014_v8  ;;  %v1179_v8 = vsel %vm1178_vm0, %v4607_v9, %v1177_v59 }
  0xcf   : > { %v4609_v11 = vpop.permute.xlu0 %737 }
  0xd0   : > { %v589_v14 = vpop.permute.xlu1 %588  ;;  %v4618_v19 = vadd.f32 %v1039_v13, %v885_v15  ;;  %v1181_v13 = vand.u32 2147483648, %v4607_v9  ;;  %v828_v42 = vsub.f32 %v4609_v11, %v4585_v49 }
  0xd1   : > { %4058 = vset.pattern.permute.xlu1 %v4270_v2  ;;  %v679_v44 = vsub.f32 %v589_v14, %v4590_v51 }
  0xd2   : > { %643 = vperm.xlu1 %4058, %v4492_v21   ;;  %4074 = vrsqrt.f32 %v4618_v19  ;;  %v1182_v14 = vsel %vm1180_vm1, %v1181_v13, %v1179_v8  ;;  %vm1157_vm2 = vcmp.eq.f32.partialorder %v4618_v19, inf  ;;  %vm1159_vm3 = vcmp.eq.f32.partialorder %v4618_v19, 0.0  ;;  %v4699_v13 = vld [vmem:[%s4428_s24 + $0x80] sm:$0xff]  ;;  %s3400_s24 = sadd.s32 %s4251_s30, %s3645_s1  ;;  %s4273_s30 = smov [#allocation4]  }
  0xd3   : > { %v4616_v18 = vpop.permute.xlu0 %721  ;;  %v704_v55 = vmul.f32 %v679_v44, %v679_v44  ;;  %v1010_v44 = vsub.f32 %v4552_v34, %v4593_v53  ;;  %s3646_s0 = sshll.u32 %s3400_s24, 4  ;;  %s4179_s26 = sshll.u32 %s4273_s30, 4  ;;  %s4180_s26 = int_to_ptr.vmem [resolvable:$false] %s4179_s26 }
  0xd4   : > { %s4181_s1 = scalar_lea.vmem %s4180_s26, 32  ;;  %p4182_p4 = scmp.lt.s32.totalorder %s3405_s2, %s4180_s26 }
  0xd5   : > { %v941_v20 = vpop.permute.xlu1 %940  ;;  %v883_v61 = vadd.f32 %v858_v54, %v704_v55  ;;  %v1035_v8 = vmul.f32 %v1010_v44, %v1010_v44  ;;  %p4183_p5 = scmp.lt.s32.totalorder %s4181_s1, %s4175_s25 }
  0xd6   : > { %v1013_v28 = vsub.f32 %v941_v20, %v4593_v53  ;;  %4059 = vset.pattern.permute.xlu1 %v4269_v1 }
  0xd7   : > { %984 = vperm.xlu1 %4059, %v527_v58   ;;  %v4622_v31 = vpop.permute.xlu0 %817  ;;  %p4184_p6 = por %p4183_p5, %p4182_p4 }
  0xd8   : > { %v1038_v37 = vmul.f32 %v1013_v28, %v1013_v28  ;;  %v862_v28 = vmul.f32 %v837_v12, %v837_v12 }
  0xd9   : > { %p4185_p7 = pnand %p4184_p6, %p4178_p2 }
  0xda   : > { %v4627_v45 = vpop.permute.xlu1 %753  ;;  %v4632_v48 = vadd.f32 %v1038_v37, %v884_v39 }
  0xdb   : > { %4060 = vset.pattern.permute.xlu1 %v4270_v2  ;;  %v4630_v47 = vpop.permute.xlu0 %801 }
  0xdc   : > { %638 = vperm.xlu1 %4060, %v4498_v22   ;;  %4076 = vrsqrt.f32 %v4632_v48  ;;  %vm1150_vm4 = vcmp.eq.f32.partialorder %v4632_v48, inf  ;;  %vm1152_vm5 = vcmp.eq.f32.partialorder %v4632_v48, 0.0 }
  0xdf   : > { %v937_v56 = vpop.permute.xlu1 %936  ;;  %v4635_v57 = vpop.permute.xlu0 %797 }
  0xe0   : > { %v1012_v58 = vsub.f32 %v937_v56, %v4593_v53  ;;  %4062 = vset.pattern.permute.xlu1 %v4269_v1  ;;  %v4075_v4 = vpop.eup %4074  ;;  %v1160_v56 = vand.u32 2147483648, %v4618_v19 }
  0xe1   : > { %980 = vperm.xlu1 %4062, %v4492_v21   ;;  %v1016_v21 = vsub.f32 %v4539_v29, %v4593_v53  ;;  %v1156_v15 = vmul.f32 %v4075_v4, %v4618_v19 }
  0xe2   : > { %v1037_v62 = vmul.f32 %v1012_v58, %v1012_v58 }
  0xe3   : > { %v1041_v35 = vmul.f32 %v1016_v21, %v1016_v21  ;;  %v1158_v52 = vsel %vm1157_vm2, %v4618_v19, %v1156_v15  ;;  %v1153_v15 = vand.u32 2147483648, %v4632_v48 }
  0xe4   : > { %v4645_v63 = vadd.f32 %v1037_v62, %v883_v61  ;;  %v4647_v0 = vpop.permute.xlu1 %749  ;;  %v619_v3 = vpop.permute.xlu0 %618  ;;  %v1161_v41 = vsel %vm1159_vm3, %v1160_v56, %v1158_v52  ;;  %v1040_v62 = vmul.f32 %v1015_v27, %v1015_v27 }
  0xe5   : > { %v685_v50 = vsub.f32 %v619_v3, %v4590_v51  ;;  %4063 = vset.pattern.permute.xlu1 %v4271_v6  ;;  %v861_v3 = vmul.f32 %v836_v30, %v836_v30 }
  0xe6   : > { %4078 = vrsqrt.f32 %v4645_v63  ;;  %793 = vperm.xlu1 %4063, %v4521_v24   ;;  %v1267_v24 = vmul.f32 2e-05, %v1182_v14  ;;  %vm1143_vm6 = vcmp.eq.f32.partialorder %v4645_v63, inf  ;;  %vm1145_vm7 = vcmp.eq.f32.partialorder %v4645_v63, 0.0 }
  0xe7   : > { %v710_v33 = vmul.f32 %v685_v50, %v685_v50  ;;  %v1264_v50 = vmul.f32 2e-05, %v1161_v41 }
  0xe8   : > { %v609_v16 = vpop.permute.xlu0 %608  ;;  %v1292_v59 = vadd.f32 %v1267_v24, %v4607_v9  ;;  %v4695_v9 = vmul.f32 %v1006_v32, %v1006_v32 }
  0xe9   : > { %v889_v20 = vadd.f32 %v864_v10, %v710_v33  ;;  %v683_v29 = vsub.f32 %v609_v16, %v4590_v51  ;;  %v4664_v23 = vpop.permute.xlu1 %573  ;;  %v4077_v55 = vpop.eup %4076  ;;  %v832_v10 = vsub.f32 %v4627_v45, %v4585_v49 }
  0xea   : > { %4064 = vset.pattern.permute.xlu1 %v4269_v1  ;;  %v1149_v4 = vmul.f32 %v4077_v55, %v4632_v48  ;;  %v1317_v14 = vmul.f32 -25.0, %v1292_v59  ;;  %v676_v44 = vsub.f32 %v4664_v23, %v4590_v51 }
  0xeb   : > { %v4670_v37 = vadd.f32 %v1043_v17, %v889_v20  ;;  %v708_v39 = vmul.f32 %v683_v29, %v683_v29  ;;  %976 = vperm.xlu1 %4064, %v4498_v22   ;;  %v831_v20 = vsub.f32 %v4647_v0, %v4585_v49  ;;  %v857_v27 = vmul.f32 %v832_v10, %v832_v10 }
  0xec   : > { %v604_v54 = vpop.permute.xlu0 %603  ;;  %v1151_v16 = vsel %vm1150_vm4, %v4632_v48, %v1149_v4  ;;  %v1356_v52 = vmul.f32 1.442695, %v1317_v14  ;;  %v4739_v10 = vmul.f32 %v828_v42, %v828_v42 }
  0xed   : > { %4080 = vrsqrt.f32 %v4670_v37  ;;  %v887_v58 = vadd.f32 %v862_v28, %v708_v39  ;;  %v682_v22 = vsub.f32 %v604_v54, %v4590_v51  ;;  %v1289_v39 = vadd.f32 %v1264_v50, %v4618_v19 }
  0xee   : > { %v746_v34 = vpop.permute.xlu1 %745  ;;  %v1154_v0 = vsel %vm1152_vm5, %v1153_v15, %v1151_v16  ;;  %v856_v55 = vmul.f32 %v831_v20, %v831_v20  ;;  %vm1185_vm8 = vcmp.eq.f32.partialorder %v4670_v37, inf  ;;  %vm1187_vm11 = vcmp.eq.f32.partialorder %v4670_v37, 0.0 }
  0xef   : > { %v4687_v60 = vadd.f32 %v1041_v35, %v887_v58  ;;  %v707_v61 = vmul.f32 %v682_v22, %v682_v22  ;;  %4065 = vset.pattern.permute.xlu1 %v4271_v6  ;;  %v1146_v58 = vand.u32 2147483648, %v4645_v63  ;;  %v1314_v23 = vmul.f32 -25.0, %v1289_v39 }
  0xf0   : > { %v584_v7 = vpop.permute.xlu0 %583  ;;  %789 = vperm.xlu1 %4065, %v4527_v25   ;;  %v829_v25 = vsub.f32 %v4602_v5, %v4585_v49  ;;  %v830_v5 = vsub.f32 %v746_v34, %v4585_v49  ;;  %v1263_v59 = vmul.f32 2e-05, %v1154_v0 }
  0xf1   : > { %4082 = vrsqrt.f32 %v4687_v60  ;;  %v886_v21 = vadd.f32 %v861_v3, %v707_v61  ;;  %v678_v12 = vsub.f32 %v584_v7, %v4590_v51  ;;  %v4733_v61 = vsub.f32 %v4563_v38, %v4593_v53 }
  0xf2   : > { %v855_v11 = vmul.f32 %v830_v5, %v830_v5  ;;  %v701_v3 = vmul.f32 %v676_v44, %v676_v44  ;;  %v854_v4 = vmul.f32 %v829_v25, %v829_v25  ;;  %v4742_v38 = vmul.f32 1.442695, %v1314_v23 }
  0xf3   : > { %v4079_v33 = vpop.eup %4078  ;;  %v569_v45 = vpop.permute.xlu1 %568  ;;  %v4709_v29 = vadd.f32 %v1040_v62, %v886_v21  ;;  %v703_v28 = vmul.f32 %v678_v12, %v678_v12  ;;  %v1288_v14 = vadd.f32 %v1263_v59, %v4632_v48  ;;  %vm1171_vm9 = vcmp.eq.f32.partialorder %v4687_v60, inf }
  0xf4   : > { %v1142_v17 = vmul.f32 %v4079_v33, %v4645_v63  ;;  %v579_v35 = vpop.permute.xlu0 %578  ;;  %4067 = vset.pattern.permute.xlu1 %v4270_v2  ;;  %v675_v7 = vsub.f32 %v569_v45, %v4590_v51  ;;  %v880_v50 = vadd.f32 %v855_v11, %v701_v3  ;;  %v1188_v45 = vand.u32 2147483648, %v4670_v37 }
  0xf5   : > { %v677_v24 = vsub.f32 %v579_v35, %v4590_v51  ;;  %623 = vperm.xlu1 %4067, %v4699_v13   ;;  %4084 = vrsqrt.f32 %v4709_v29  ;;  %v882_v30 = vadd.f32 %v857_v27, %v703_v28  ;;  %v1174_v16 = vand.u32 2147483648, %v4687_v60 }
  0xf6   : > { %v1144_v54 = vsel %vm1143_vm6, %v4645_v63, %v1142_v17  ;;  %v700_v48 = vmul.f32 %v675_v7, %v675_v7  ;;  %vm1173_vm10 = vcmp.eq.f32.partialorder %v4687_v60, 0.0  ;;  %vm1164_vm12 = vcmp.eq.f32.partialorder %v4709_v29, inf }
  0xf7   : > { %v702_v56 = vmul.f32 %v677_v24, %v677_v24  ;;  %v4725_v22 = vadd.f32 %v1036_v36, %v882_v30  ;;  %v1147_v62 = vsel %vm1145_vm7, %v1146_v58, %v1144_v54  ;;  %vm1166_vm13 = vcmp.eq.f32.partialorder %v4709_v29, 0.0 }
  0xf8   : > { %v925_v19 = vpop.permute.xlu1 %924  ;;  %v1262_v15 = vmul.f32 2e-05, %v1147_v62  ;;  %v1167_v44 = vand.u32 2147483648, %v4709_v29  ;;  %v879_v30 = vadd.f32 %v854_v4, %v700_v48 }
  0xf9   : > { %v1009_v32 = vsub.f32 %v925_v19, %v4593_v53  ;;  %4068 = vset.pattern.permute.xlu1 %v4271_v6  ;;  %v881_v41 = vadd.f32 %v856_v55, %v702_v56  ;;  %4086 = vrsqrt.f32 %v4725_v22  ;;  %vm1136_vm14 = vcmp.eq.f32.partialorder %v4725_v22, inf }
  0xfa   : > { %v4081_v34 = vpop.eup %4080  ;;  %785 = vperm.xlu1 %4068, %v4699_v13   ;;  %4088 = vpow2.f32 %v1356_v52  ;;  %v1287_v35 = vadd.f32 %v1262_v15, %v4645_v63  ;;  %vm1138_vm15 = vcmp.eq.f32.partialorder %v4725_v22, 0.0 }
  0xfb   : > { %v4737_v6 = vadd.f32 %v1035_v8, %v881_v41  ;;  %v1034_v36 = vmul.f32 %v1009_v32, %v1009_v32  ;;  %v1184_v12 = vmul.f32 %v4081_v34, %v4670_v37 }
  0xfc   : > { %v4772_v19 = vmul.f32 -25.0, %v1287_v35 }
  0xfd   : > { %v564_v21 = vpop.permute.xlu1 %563  ;;  %4090 = vrsqrt.f32 %v4737_v6  ;;  %v4748_v25 = vadd.f32 %v1034_v36, %v880_v50  ;;  %v1186_v17 = vsel %vm1185_vm8, %v4670_v37, %v1184_v12  ;;  %vm1129_vm0 = vcmp.eq.f32.partialorder %v4737_v6, inf }
  0xfe   : > { %v4083_v33 = vpop.eup %4082  ;;  %4069 = vset.pattern.permute.xlu1 %v4269_v1  ;;  %v559_v1 = vpop.permute.xlu0 %558  ;;  %v1189_v28 = vsel %vm1187_vm11, %v1188_v45, %v1186_v17  ;;  %v674_v41 = vsub.f32 %v564_v21, %v4590_v51  ;;  %vm1131_vm1 = vcmp.eq.f32.partialorder %v4737_v6, 0.0 }
  0xff   : > { %v1170_v8 = vmul.f32 %v4083_v33, %v4687_v60  ;;  %964 = vperm.xlu1 %4069, %v4699_v13   ;;  %4092 = vrsqrt.f32 %v4748_v25  ;;  %v4760_v13 = vmul.f32 -25.0, %v1288_v14  ;;  %v1268_v42 = vmul.f32 2e-05, %v1189_v28 }
 0x100   : > { %v673_v52 = vsub.f32 %v559_v1, %v4590_v51  ;;  %v699_v17 = vmul.f32 %v674_v41, %v674_v41  ;;  %vm1122_vm2 = vcmp.eq.f32.partialorder %v4748_v25, inf  ;;  %vm1124_vm3 = vcmp.eq.f32.partialorder %v4748_v25, 0.0 }
 0x101   : > { %v1172_v20 = vsel %vm1171_vm9, %v4687_v60, %v1170_v8  ;;  %v1293_v56 = vadd.f32 %v1268_v42, %v4670_v37  ;;  %v1132_v8 = vand.u32 2147483648, %v4737_v6 }
 0x102   : > { %v1175_v27 = vsel %vm1173_vm10, %v1174_v16, %v1172_v20  ;;  %v921_v5 = vpop.permute.xlu1 %920  ;;  %v4085_v0 = vpop.eup %4084  ;;  %v698_v3 = vmul.f32 %v673_v52, %v673_v52 }
 0x103   : > { %v1266_v24 = vmul.f32 2e-05, %v1175_v27  ;;  %v1008_v39 = vsub.f32 %v921_v5, %v4593_v53  ;;  %4071 = vset.pattern.permute.xlu1 %v4270_v2  ;;  %v1163_v54 = vmul.f32 %v4085_v0, %v4709_v29  ;;  %v1139_v2 = vand.u32 2147483648, %v4725_v22  ;;  %v554_v58 = vpop.permute.xlu0 %553 }
 0x104   : > { %v1318_v23 = vmul.f32 -25.0, %v1293_v56  ;;  %v672_v36 = vsub.f32 %v554_v58, %v4590_v51 }
 0x105   : > { %v1291_v63 = vadd.f32 %v1266_v24, %v4687_v60  ;;  %v1033_v55 = vmul.f32 %v1008_v39, %v1008_v39  ;;  %v1165_v32 = vsel %vm1164_vm12, %v4709_v29, %v1163_v54  ;;  %v878_v54 = vadd.f32 %v4739_v10, %v699_v17 }
 0x106   : > { %v4087_v59 = vpop.eup %4086  ;;  %v1168_v37 = vsel %vm1166_vm13, %v1167_v44, %v1165_v32  ;;  %v1358_v45 = vmul.f32 1.442695, %v1318_v23  ;;  %v697_v39 = vmul.f32 %v672_v36, %v672_v36  ;;  %vm1378_vm12 = vcmask 588800  }
 0x107   : > { %v1316_v11 = vmul.f32 -25.0, %v1291_v63  ;;  %v4780_v60 = vadd.f32 %v1033_v55, %v879_v30  ;;  %v734_v34 = vpop.permute.xlu1 %733  ;;  %v1265_v4 = vmul.f32 2e-05, %v1168_v37  ;;  %v1135_v7 = vmul.f32 %v4087_v59, %v4725_v22  ;;  %v4789_v50 = vpop.eup %4088 }
 0x108   : > { %v827_v62 = vsub.f32 %v734_v34, %v4585_v49  ;;  %v1125_v63 = vand.u32 2147483648, %v4748_v25  ;;  %v1346_v37 = vmul.f32 1.442695, %v4772_v19 }
 0x109   : > { %4094 = vrsqrt.f32 %v4780_v60  ;;  %v1354_v12 = vmul.f32 1.442695, %v1316_v11  ;;  %v1290_v21 = vadd.f32 %v1265_v4, %v4709_v29  ;;  %v1137_v15 = vsel %vm1136_vm14, %v4725_v22, %v1135_v7 }
 0x10a   : > { %v852_v33 = vmul.f32 %v827_v62, %v827_v62  ;;  %v4091_v14 = vpop.eup %4090  ;;  %v1140_v16 = vsel %vm1138_vm15, %v1139_v2, %v1137_v15  ;;  %4096 = vpow2.f32 %v1358_v45  ;;  %v1348_v11 = vmul.f32 1.442695, %v4760_v13 }
 0x10b   : > { %v1128_v48 = vmul.f32 %v4091_v14, %v4737_v6  ;;  %v1315_v35 = vmul.f32 -25.0, %v1290_v21  ;;  %v1261_v27 = vmul.f32 2e-05, %v1140_v16  ;;  %4098 = vpow2.f32 %v1354_v12 }
 0x10c   : > { %v877_v20 = vadd.f32 %v852_v33, %v698_v3  ;;  %v917_v1 = vpop.permute.xlu1 %916  ;;  %v4093_v29 = vpop.eup %4092  ;;  %v1030_v62 = vmul.f32 %v4733_v61, %v4733_v61  ;;  %vm1115_vm4 = vcmp.eq.f32.partialorder %v4780_v60, inf  ;;  %vm1117_vm5 = vcmp.eq.f32.partialorder %v4780_v60, 0.0 }
 0x10d   : > { %v1007_v5 = vsub.f32 %v917_v1, %v4593_v53  ;;  %v1130_v28 = vsel %vm1129_vm0, %v4737_v6, %v1128_v48  ;;  %v1352_v42 = vmul.f32 1.442695, %v1315_v35  ;;  %v1286_v0 = vadd.f32 %v1261_v27, %v4725_v22 }
 0x10e   : > { %v4806_v24 = vadd.f32 %v4695_v9, %v877_v20  ;;  %v1133_v44 = vsel %vm1131_vm1, %v1132_v8, %v1130_v28  ;;  %v1121_v30 = vmul.f32 %v4093_v29, %v4748_v25 }
 0x10f   : > { %v1260_v52 = vmul.f32 2e-05, %v1133_v44  ;;  %v1032_v55 = vmul.f32 %v1007_v5, %v1007_v5  ;;  %v1311_v32 = vmul.f32 -25.0, %v1286_v0 }
 0x110   : > { %4100 = vrsqrt.f32 %v4806_v24  ;;  %v1123_v9 = vsel %vm1122_vm2, %v4748_v25, %v1121_v30  ;;  %vm1101_vm6 = vcmp.eq.f32.partialorder %v4806_v24, inf  ;;  %v1104_v1 = vand.u32 2147483648, %v4806_v24 }
 0x111   : > { %v730_v22 = vpop.permute.xlu1 %729  ;;  %v1285_v56 = vadd.f32 %v1260_v52, %v4737_v6  ;;  %v1126_v2 = vsel %vm1124_vm3, %v1125_v63, %v1123_v9  ;;  %4102 = vpow2.f32 %v1352_v42  ;;  %v4821_v23 = vadd.f32 %v1032_v55, %v878_v54 }
 0x112   : > { %v826_v58 = vsub.f32 %v730_v22, %v4585_v49  ;;  %v1259_v34 = vmul.f32 2e-05, %v1126_v2  ;;  %4104 = vpow2.f32 %v4742_v38  ;;  %v1344_v4 = vmul.f32 1.442695, %v1311_v32 }
 0x113   : > { %v1310_v10 = vmul.f32 -25.0, %v1285_v56  ;;  %4106 = vrsqrt.f32 %v4821_v23  ;;  %v1118_v38 = vand.u32 2147483648, %v4780_v60  ;;  %vm1103_vm7 = vcmp.eq.f32.partialorder %v4806_v24, 0.0 }
 0x114   : > { %v851_v59 = vmul.f32 %v826_v58, %v826_v58  ;;  %v1284_v41 = vadd.f32 %v1259_v34, %v4748_v25  ;;  %4108 = vpow2.f32 %v1348_v11  ;;  %vm1108_vm8 = vcmp.eq.f32.partialorder %v4821_v23, inf }
 0x115   : > { %4110 = vpow2.f32 %v1346_v37  ;;  %v1342_v25 = vmul.f32 1.442695, %v1310_v10  ;;  %v1111_v30 = vand.u32 2147483648, %v4821_v23  ;;  %vm1110_vm9 = vcmp.eq.f32.partialorder %v4821_v23, 0.0 }
 0x116   : > { %v4095_v6 = vpop.eup %4094  ;;  %v876_v3 = vadd.f32 %v851_v59, %v697_v39  ;;  %v549_v13 = vpop.permute.xlu1 %548  ;;  %v1309_v7 = vmul.f32 -25.0, %v1284_v41  ;;  %v824_v11 = vsub.f32 %v4616_v18, %v4585_v49 }
 0x117   : > { %v1114_v36 = vmul.f32 %v4095_v6, %v4780_v60  ;;  %v4097_v61 = vpop.eup %4096  ;;  %v671_v42 = vsub.f32 %v549_v13, %v4590_v51 }
 0x118   : > { %v4832_v19 = vadd.f32 %v1030_v62, %v876_v3  ;;  %v4099_v14 = vpop.eup %4098  ;;  %v1340_v21 = vmul.f32 1.442695, %v1309_v7  ;;  %1395 = vmatpush1.msra.mxu0 %v4097_v61 }
 0x119   : > { %v1116_v12 = vsel %vm1115_vm4, %v4780_v60, %v1114_v36  ;;  %1396 = vmatprep.subr.mxu0 %v4272_v26  ;;  %v696_v56 = vmul.f32 %v671_v42, %v671_v42 }
 0x11a   : > { %v1119_v33 = vsel %vm1117_vm5, %v1118_v38, %v1116_v12  ;;  %4112 = vrsqrt.f32 %v4832_v19  ;;  %1397 = vmatpush1.msra.mxu0 %v4789_v50  ;;  %vm1094_vm10 = vcmp.eq.f32.partialorder %v4832_v19, inf  ;;  %vm1096_vm11 = vcmp.eq.f32.partialorder %v4832_v19, 0.0 }
 0x11b   : > { %v1258_v15 = vmul.f32 2e-05, %v1119_v33  ;;  %v726_v8 = vpop.permute.xlu1 %725  ;;  %4114 = vpow2.f32 %v1344_v4  ;;  %1398 = vmatprep.subr.mxu0 %v4272_v26  ;;  %v1097_v6 = vand.u32 2147483648, %v4832_v19  ;;  %v849_v33 = vmul.f32 %v824_v11, %v824_v11 }
 0x11c   : > { %4116 = vpow2.f32 %v1342_v25  ;;  %1399 = vmatpush1.msra.mxu0 %v4099_v14  ;;  %v532_v25 = vld [vmem:[%s4876_s20 + $0x8] sm:$0xff] }
 0x11d   : > { %v4101_v45 = vpop.eup %4100  ;;  %v1283_v16 = vadd.f32 %v1258_v15, %v4780_v60  ;;  %4118 = vpow2.f32 %v1340_v21  ;;  %v825_v60 = vsub.f32 %v726_v8, %v4585_v49  ;;  %1400 = vmatprep.subr.mxu0 %v4272_v26  ;;  %3511 = vmatprep.mubr.msk.f32.mxu0 %vm1378_vm12, %v532_v25  ;;  %v659_v15 = vpop.permute.xlu0 %658 }
 0x11e   : > { %v1100_v48 = vmul.f32 %v4101_v45, %v4806_v24  ;;  %v4103_v17 = vpop.eup %4102 }
 0x11f   : > { %v1308_v20 = vmul.f32 -25.0, %v1283_v16  ;;  %v4105_v27 = vpop.eup %4104  ;;  %1401 = vmatpush1.msra.mxu0 %v4103_v17  ;;  %v850_v52 = vmul.f32 %v825_v60, %v825_v60  ;;  %v693_v17 = vsub.f32 %v659_v15, %v4590_v51  ;;  %v1498_v15 = vld [vmem:[%s5643_s4] sm:$0xff] }
 0x120   : > { %v1102_v35 = vsel %vm1101_vm6, %v4806_v24, %v1100_v48  ;;  %v544_v50 = vpop.permute.xlu1 %543  ;;  %v4107_v28 = vpop.eup %4106  ;;  %1402 = vmatprep.subr.mxu0 %v4272_v26 }
 0x121   : > { %v1338_v5 = vmul.f32 1.442695, %v1308_v20  ;;  %v1105_v29 = vsel %vm1103_vm7, %v1104_v1, %v1102_v35  ;;  %v1107_v0 = vmul.f32 %v4107_v28, %v4821_v23  ;;  %1403 = vmatpush1.msra.mxu0 %v4105_v27  ;;  %v4109_v44 = vpop.eup %4108  ;;  %v875_v59 = vadd.f32 %v850_v52, %v696_v56 }
 0x122   : > { %v1256_v39 = vmul.f32 2e-05, %v1105_v29  ;;  %1404 = vmatprep.subr.mxu0 %v4272_v26  ;;  %v4111_v55 = vpop.eup %4110  ;;  %v670_v3 = vsub.f32 %v544_v50, %v4590_v51  ;;  %v1026_v27 = vsub.f32 %v4567_v40, %v4593_v53  ;;  %v848_v28 = vsub.f32 %v4622_v31, %v4585_v49  ;;  %v1501_v31 = vld [vmem:[%s5643_s4 + $0x18] sm:$0xff] }
 0x123   : > { %4120 = vpow2.f32 %v1338_v5  ;;  %v1109_v9 = vsel %vm1108_vm8, %v4821_v23, %v1107_v0  ;;  %1405 = vmatpush1.msra.mxu0 %v4109_v44  ;;  %v718_v5 = vmul.f32 %v693_v17, %v693_v17  ;;  %v654_v0 = vpop.permute.xlu0 %653  ;;  %1519 = vperm.xlu0 %4070, %v1501_v31  }
 0x124   : > { %v1281_v63 = vadd.f32 %v1256_v39, %v4806_v24  ;;  %v1112_v22 = vsel %vm1110_vm9, %v1111_v30, %v1109_v9  ;;  %1406 = vmatprep.subr.mxu0 %v4272_v26  ;;  %v695_v21 = vmul.f32 %v670_v3, %v670_v3  ;;  %v1051_v30 = vmul.f32 %v1026_v27, %v1026_v27 }
 0x125   : > { %v905_v54 = vpop.permute.xlu1 %904  ;;  %v1257_v32 = vmul.f32 2e-05, %v1112_v22  ;;  %1407 = vmatpush1.msra.mxu0 %v4111_v55  ;;  %v873_v9 = vmul.f32 %v848_v28, %v848_v28  ;;  %v1647_v55 = vld [vmem:[%s5645_s6 + $0x18] sm:$0xff] }
 0x126   : > { %v1004_v2 = vsub.f32 %v905_v54, %v4593_v53  ;;  %1408 = vmatprep.subr.mxu0 %v4272_v26  ;;  %v1306_v10 = vmul.f32 -25.0, %v1281_v63  ;;  %v874_v1 = vadd.f32 %v849_v33, %v695_v21  ;;  %1681 = vperm.xlu1 %4071, %v1647_v55  }
 0x127   : > { %v4113_v58 = vpop.eup %4112  ;;  %v1282_v41 = vadd.f32 %v1257_v32, %v4821_v23 }
 0x128   : > { %v4115_v24 = vpop.eup %4114  ;;  %v1093_v34 = vmul.f32 %v4113_v58, %v4832_v19  ;;  %v1029_v37 = vmul.f32 %v1004_v2, %v1004_v2  ;;  %v1334_v12 = vmul.f32 1.442695, %v1306_v10  ;;  %v692_v2 = vsub.f32 %v654_v0, %v4590_v51 }
 0x129   : > { %1409 = vmatpush1.msra.mxu0 %v4115_v24  ;;  %v4117_v18 = vpop.eup %4116  ;;  %v1307_v7 = vmul.f32 -25.0, %v1282_v41 }
 0x12a   : > { %v1095_v62 = vsel %vm1094_vm10, %v4832_v19, %v1093_v34  ;;  %v4870_v13 = vadd.f32 %v1029_v37, %v875_v59  ;;  %1410 = vmatprep.subr.mxu0 %v4272_v26  ;;  %v664_v4 = vpop.permute.xlu1 %663  ;;  %v4119_v23 = vpop.eup %4118  ;;  %v1500_v34 = vld [vmem:[%s5643_s4 + $0x10] sm:$0xff]  ;;  %v717_v3 = vmul.f32 %v692_v2, %v692_v2 }
 0x12b   : > { %v1098_v36 = vsel %vm1096_vm11, %v1097_v6, %v1095_v62  ;;  %1411 = vmatpush1.msra.mxu0 %v4117_v18  ;;  %v1336_v61 = vmul.f32 1.442695, %v1307_v7  ;;  %v1646_v37 = vld [vmem:[%s5645_s6 + $0x10] sm:$0xff]  ;;  %v1025_v62 = vsub.f32 %v4573_v43, %v4593_v53  ;;  %1514 = vperm.xlu1 %4071, %v1500_v34   ;;  %v1645_v43 = vld [vmem:[%s5645_s6 + $0x8] sm:$0xff] }
 0x12c   : > { %v1255_v38 = vmul.f32 2e-05, %v1098_v36  ;;  %4122 = vrsqrt.f32 %v4870_v13  ;;  %1412 = vmatprep.subr.mxu0 %v4272_v26  ;;  %vm1087_vm13 = vcmp.eq.f32.partialorder %v4870_v13, inf  ;;  %v1090_v22 = vand.u32 2147483648, %v4870_v13  ;;  %1676 = vperm.xlu0 %4070, %v1646_v37   ;;  %v1499_v36 = vld [vmem:[%s5643_s4 + $0x8] sm:$0xff] }
 0x12d   : > { %1413 = vmatpush1.msra.mxu0 %v4119_v23  ;;  %4124 = vpow2.f32 %v1336_v61  ;;  %vm1089_vm14 = vcmp.eq.f32.partialorder %v4870_v13, 0.0  ;;  %v1050_v61 = vmul.f32 %v1025_v62, %v1025_v62 }
 0x12e   : > { %v1280_v14 = vadd.f32 %v1255_v38, %v4832_v19  ;;  %1414 = vmatprep.subr.mxu0 %v4272_v26  ;;  %4126 = vpow2.f32 %v1334_v12  ;;  %v694_v19 = vsub.f32 %v664_v4, %v4590_v51 }
 0x12f   : > { %v901_v8 = vpop.permute.xlu1 %900  ;;  %1509 = vperm.xlu1 %4071, %v1499_v36  }
 0x130   : > { %v4121_v45 = vpop.eup %4120  ;;  %v1305_v16 = vmul.f32 -25.0, %v1280_v14  ;;  %v1003_v48 = vsub.f32 %v901_v8, %v4593_v53  ;;  %v719_v42 = vmul.f32 %v694_v19, %v694_v19  ;;  %1671 = vperm.xlu0 %4070, %v1645_v43   ;;  %v2004_v19 = vld [vmem:[%s5647_s8 + $0x10] sm:$0xff] }
 0x131   : > { %1415 = vmatpush1.msra.mxu0 %v4121_v45 }
 0x132   : > { %v1332_v20 = vmul.f32 1.442695, %v1305_v16  ;;  %v1028_v35 = vmul.f32 %v1003_v48, %v1003_v48  ;;  %1416 = vmatprep.subr.mxu0 %v4272_v26  ;;  %v898_v32 = vadd.f32 %v873_v9, %v719_v42  ;;  %v1644_v16 = vld [vmem:[%s5645_s6] sm:$0xff] }
 0x133   : > { %1504 = vperm.xlu1 %4071, %v1498_v15  }
 0x134   : > { %v4888_v60 = vadd.f32 %v1028_v35, %v874_v1  ;;  %v814_v50 = vpop.permute.xlu1 %813  ;;  %4128 = vpow2.f32 %v1332_v20  ;;  %1666 = vperm.xlu0 %4070, %v1644_v16   ;;  %v2005_v35 = vld [vmem:[%s5647_s8 + $0x18] sm:$0xff] }
 0x135   : > { %v847_v29 = vsub.f32 %v814_v50, %v4585_v49 }
 0x136   : > { %4130 = vrsqrt.f32 %v4888_v60  ;;  %vm1080_vm15 = vcmp.eq.f32.partialorder %v4888_v60, inf  ;;  %v1083_v8 = vand.u32 2147483648, %v4888_v60  ;;  %vm1082_vm0 = vcmp.eq.f32.partialorder %v4888_v60, 0.0 }
 0x137   : > { %v872_v39 = vmul.f32 %v847_v29, %v847_v29  ;;  %2023 = vperm.xlu1 %4071, %v2005_v35  }
 0x138   : > { %2018 = vperm.xlu0 %4070, %v2004_v19  }
 0x139   : > { %v4123_v44 = vpop.eup %4122  ;;  %v897_v52 = vadd.f32 %v872_v39, %v718_v5  ;;  %v997_v63 = vpop.permute.xlu1 %996  ;;  %v2003_v39 = vld [vmem:[%s5647_s8 + $0x8] sm:$0xff] }
 0x13a   : > { %v1086_v54 = vmul.f32 %v4123_v44, %v4870_v13  ;;  %v1027_v40 = vsub.f32 %v997_v63, %v4593_v53  ;;  %v4125_v58 = vpop.eup %4124 }
 0x13b   : > { %v4906_v56 = vadd.f32 %v1051_v30, %v897_v52  ;;  %1417 = vmatpush1.msra.mxu0 %v4125_v58  ;;  %v4127_v10 = vpop.eup %4126  ;;  %2013 = vperm.xlu1 %4071, %v2003_v39  }
 0x13c   : > { %v1088_v11 = vsel %vm1087_vm13, %v4870_v13, %v1086_v54  ;;  %v1052_v24 = vmul.f32 %v1027_v40, %v1027_v40  ;;  %1418 = vmatprep.subr.mxu0 %v4272_v26 }
 0x13d   : > { %v1091_v59 = vsel %vm1089_vm14, %v1090_v22, %v1088_v11  ;;  %4132 = vrsqrt.f32 %v4906_v56  ;;  %1419 = vmatpush1.msra.mxu0 %v4127_v10  ;;  %vm1241_vm1 = vcmp.eq.f32.partialorder %v4906_v56, inf  ;;  %v1244_v28 = vand.u32 2147483648, %v4906_v56 }
 0x13e   : > { %v1254_v41 = vmul.f32 2e-05, %v1091_v59  ;;  %v4918_v6 = vadd.f32 %v1052_v24, %v898_v32  ;;  %v810_v18 = vpop.permute.xlu1 %809  ;;  %1420 = vmatprep.subr.mxu0 %v4272_v26  ;;  %vm1243_vm2 = vcmp.eq.f32.partialorder %v4906_v56, 0.0  ;;  %v634_v24 = vpop.permute.xlu0 %633 }
 0x13f   : > { %v846_v4 = vsub.f32 %v810_v18, %v4585_v49  ;;  %v688_v35 = vsub.f32 %v634_v24, %v4590_v51 }
 0x140   : > { %v1279_v7 = vadd.f32 %v1254_v41, %v4870_v13  ;;  %4134 = vrsqrt.f32 %v4918_v6  ;;  %vm1248_vm3 = vcmp.eq.f32.partialorder %v4918_v6, inf  ;;  %v1251_v54 = vand.u32 2147483648, %v4918_v6 }
 0x141   : > { %v4129_v23 = vpop.eup %4128  ;;  %v871_v38 = vmul.f32 %v846_v4, %v846_v4  ;;  %vm1250_vm4 = vcmp.eq.f32.partialorder %v4918_v6, 0.0 }
 0x142   : > { %v1304_v25 = vmul.f32 -25.0, %v1279_v7  ;;  %1421 = vmatpush1.msra.mxu0 %v4129_v23 }
 0x143   : > { %v4131_v12 = vpop.eup %4130  ;;  %v896_v13 = vadd.f32 %v871_v38, %v717_v3  ;;  %v649_v33 = vpop.permute.xlu1 %648  ;;  %1422 = vmatprep.subr.mxu0 %v4272_v26 }
 0x144   : > { %v1330_v14 = vmul.f32 1.442695, %v1304_v25  ;;  %v1079_v21 = vmul.f32 %v4131_v12, %v4888_v60  ;;  %v691_v40 = vsub.f32 %v649_v33, %v4590_v51  ;;  %v844_v12 = vsub.f32 %v4630_v47, %v4585_v49 }
 0x145   : > { %v4940_v45 = vadd.f32 %v1050_v61, %v896_v13  ;;  %v629_v13 = vpop.permute.xlu0 %628 }
 0x146   : > { %4136 = vpow2.f32 %v1330_v14  ;;  %v1081_v48 = vsel %vm1080_vm15, %v4888_v60, %v1079_v21  ;;  %v716_v34 = vmul.f32 %v691_v40, %v691_v40 }
 0x147   : > { %v1084_v17 = vsel %vm1082_vm0, %v1083_v8, %v1081_v48  ;;  %4138 = vrsqrt.f32 %v4940_v45  ;;  %vm1234_vm5 = vcmp.eq.f32.partialorder %v4940_v45, inf  ;;  %v1237_v4 = vand.u32 2147483648, %v4940_v45 }
 0x148   : > { %v1253_v20 = vmul.f32 2e-05, %v1084_v17  ;;  %v806_v1 = vpop.permute.xlu1 %805  ;;  %vm1236_vm6 = vcmp.eq.f32.partialorder %v4940_v45, 0.0  ;;  %v869_v8 = vmul.f32 %v844_v12, %v844_v12 }
 0x149   : > { %v973_v17 = vpop.permute.xlu0 %972 }
 0x14a   : > { %v4133_v50 = vpop.eup %4132  ;;  %v1278_v27 = vadd.f32 %v1253_v20, %v4888_v60  ;;  %v845_v60 = vsub.f32 %v806_v1, %v4585_v49  ;;  %v1021_v19 = vsub.f32 %v973_v17, %v4593_v53 }
 0x14b   : > { %v1240_v5 = vmul.f32 %v4133_v50, %v4906_v56 }
 0x14c   : > { %v1303_v29 = vmul.f32 -25.0, %v1278_v27  ;;  %v870_v2 = vmul.f32 %v845_v60, %v845_v60 }
 0x14d   : > { %v4135_v42 = vpop.eup %4134  ;;  %v1242_v0 = vsel %vm1241_vm1, %v4906_v56, %v1240_v5  ;;  %v644_v44 = vpop.permute.xlu1 %643 }
 0x14e   : > { %v1328_v30 = vmul.f32 1.442695, %v1303_v29  ;;  %v1245_v52 = vsel %vm1243_vm2, %v1244_v28, %v1242_v0  ;;  %v1247_v63 = vmul.f32 %v4135_v42, %v4918_v6  ;;  %v895_v62 = vadd.f32 %v870_v2, %v716_v34  ;;  %v969_v40 = vpop.permute.xlu0 %968 }
 0x14f   : > { %v1276_v9 = vmul.f32 2e-05, %v1245_v52  ;;  %v690_v36 = vsub.f32 %v644_v44, %v4590_v51  ;;  %v843_v29 = vsub.f32 %v4635_v57, %v4585_v49  ;;  %v713_v28 = vmul.f32 %v688_v35, %v688_v35 }
 0x150   : > { %4140 = vpow2.f32 %v1328_v30  ;;  %v1249_v55 = vsel %vm1248_vm3, %v4918_v6, %v1247_v63  ;;  %v1046_v42 = vmul.f32 %v1021_v19, %v1021_v19  ;;  %v1020_v24 = vsub.f32 %v969_v40, %v4593_v53 }
 0x151   : > { %v1301_v31 = vadd.f32 %v1276_v9, %v4906_v56  ;;  %v1252_v22 = vsel %vm1250_vm4, %v1251_v54, %v1249_v55  ;;  %v715_v14 = vmul.f32 %v690_v36, %v690_v36  ;;  %v868_v63 = vmul.f32 %v843_v29, %v843_v29 }
 0x152   : > { %v1277_v58 = vmul.f32 2e-05, %v1252_v22  ;;  %v985_v11 = vpop.permute.xlu1 %984  ;;  %vm1522_vm4 = vcmask 23552  }
 0x153   : > { %v4137_v32 = vpop.eup %4136  ;;  %v1024_v59 = vsub.f32 %v985_v11, %v4593_v53  ;;  %v1326_v10 = vmul.f32 -25.0, %v1301_v31  ;;  %v894_v1 = vadd.f32 %v869_v8, %v715_v14  ;;  %v687_v11 = vsub.f32 %v629_v13, %v4590_v51 }
 0x154   : > { %v4139_v37 = vpop.eup %4138  ;;  %v1302_v41 = vadd.f32 %v1277_v58, %v4918_v6  ;;  %1423 = vmatpush1.msra.mxu0 %v4137_v32 }
 0x155   : > { %v1233_v18 = vmul.f32 %v4139_v37, %v4940_v45  ;;  %v1049_v3 = vmul.f32 %v1024_v59, %v1024_v59  ;;  %1424 = vmatprep.subr.mxu0 %v4272_v26  ;;  %v1374_v25 = vmul.f32 1.442695, %v1326_v10 }
 0x156   : > { %v1327_v56 = vmul.f32 -25.0, %v1302_v41 }
 0x157   : > { %v1235_v7 = vsel %vm1234_vm5, %v4940_v45, %v1233_v18  ;;  %v4980_v23 = vadd.f32 %v1049_v3, %v895_v62  ;;  %v639_v6 = vpop.permute.xlu1 %638  ;;  %v712_v62 = vmul.f32 %v687_v11, %v687_v11  ;;  %vm1764_vm5 = vcmask 261120  }
 0x158   : > { %v1376_v38 = vmul.f32 1.442695, %v1327_v56  ;;  %v1238_v43 = vsel %vm1236_vm6, %v1237_v4, %v1235_v7  ;;  %v1045_v56 = vmul.f32 %v1020_v24, %v1020_v24 }
 0x159   : > { %v1275_v61 = vmul.f32 2e-05, %v1238_v43  ;;  %4142 = vrsqrt.f32 %v4980_v23  ;;  %vm1227_vm7 = vcmp.eq.f32.partialorder %v4980_v23, inf  ;;  %v1230_v57 = vand.u32 2147483648, %v4980_v23 }
 0x15a   : > { %4144 = vpow2.f32 %v1376_v38  ;;  %vm1229_vm8 = vcmp.eq.f32.partialorder %v4980_v23, 0.0 }
 0x15b   : > { %v1300_v33 = vadd.f32 %v1275_v61, %v4940_v45  ;;  %4146 = vpow2.f32 %v1374_v25  ;;  %v689_v45 = vsub.f32 %v639_v6, %v4590_v51 }
 0x15c   : > { %v981_v21 = vpop.permute.xlu1 %980 }
 0x15d   : > { %v4141_v15 = vpop.eup %4140  ;;  %v1325_v16 = vmul.f32 -25.0, %v1300_v33  ;;  %v1023_v48 = vsub.f32 %v981_v21, %v4593_v53  ;;  %v714_v0 = vmul.f32 %v689_v45, %v689_v45 }
 0x15e   : > { %1425 = vmatpush1.msra.mxu0 %v4141_v15 }
 0x15f   : > { %v1372_v20 = vmul.f32 1.442695, %v1325_v16  ;;  %v1048_v47 = vmul.f32 %v1023_v48, %v1023_v48  ;;  %1440 = vmatprep.subr.mxu0 %v4272_v26  ;;  %v893_v2 = vadd.f32 %v868_v63, %v714_v0 }
 0x161   : > { %v4991_v50 = vadd.f32 %v1048_v47, %v894_v1  ;;  %v794_v27 = vpop.permute.xlu1 %793  ;;  %4148 = vpow2.f32 %v1372_v20 }
 0x162   : > { %v842_v5 = vsub.f32 %v794_v27, %v4585_v49 }
 0x163   : > { %4150 = vrsqrt.f32 %v4991_v50  ;;  %vm1220_vm9 = vcmp.eq.f32.partialorder %v4991_v50, inf  ;;  %v1223_v25 = vand.u32 2147483648, %v4991_v50  ;;  %vm1222_vm10 = vcmp.eq.f32.partialorder %v4991_v50, 0.0 }
 0x164   : > { %v867_v39 = vmul.f32 %v842_v5, %v842_v5 }
 0x166   : > { %v4143_v60 = vpop.eup %4142  ;;  %v892_v44 = vadd.f32 %v867_v39, %v713_v28  ;;  %v977_v30 = vpop.permute.xlu1 %976 }
 0x167   : > { %v4145_v52 = vpop.eup %4144  ;;  %v1226_v9 = vmul.f32 %v4143_v60, %v4980_v23  ;;  %v1022_v54 = vsub.f32 %v977_v30, %v4593_v53 }
 0x168   : > { %v5001_v55 = vadd.f32 %v1046_v42, %v892_v44  ;;  %1441 = vmatpush2.msra.mxu0 %v4145_v52  ;;  %v4147_v31 = vpop.eup %4146 }
 0x169   : > { %v1228_v22 = vsel %vm1227_vm7, %v4980_v23, %v1226_v9  ;;  %v1047_v58 = vmul.f32 %v1022_v54, %v1022_v54  ;;  %1442 = vmatprep.subr.mxu0 %v4272_v26 }
 0x16a   : > { %v1231_v32 = vsel %vm1229_vm8, %v1230_v57, %v1228_v22  ;;  %4152 = vrsqrt.f32 %v5001_v55  ;;  %1443 = vmatpush2.msra.mxu0 %v4147_v31  ;;  %vm1206_vm11 = vcmp.eq.f32.partialorder %v5001_v55, inf  ;;  %v1209_v17 = vand.u32 2147483648, %v5001_v55 }
 0x16b   : > { %v1274_v34 = vmul.f32 2e-05, %v1231_v32  ;;  %v1072_v59 = vadd.f32 %v1047_v58, %v893_v2  ;;  %v790_v37 = vpop.permute.xlu1 %789  ;;  %1444 = vmatprep.subr.mxu0 %v4272_v26  ;;  %vm1208_vm13 = vcmp.eq.f32.partialorder %v5001_v55, 0.0 }
 0x16c   : > { %v841_v10 = vsub.f32 %v790_v37, %v4585_v49 }
 0x16d   : > { %v1299_v41 = vadd.f32 %v1274_v34, %v4980_v23  ;;  %4154 = vrsqrt.f32 %v1072_v59  ;;  %vm1213_vm14 = vcmp.eq.f32.partialorder %v1072_v59, inf  ;;  %vm1215_vm15 = vcmp.eq.f32.partialorder %v1072_v59, 0.0 }
 0x16e   : > { %v4149_v18 = vpop.eup %4148  ;;  %v866_v3 = vmul.f32 %v841_v10, %v841_v10  ;;  %v1216_v5 = vand.u32 2147483648, %v1072_v59 }
 0x16f   : > { %v1324_v4 = vmul.f32 -25.0, %v1299_v41  ;;  %1445 = vmatpush2.msra.mxu0 %v4149_v18 }
 0x170   : > { %v4151_v7 = vpop.eup %4150  ;;  %v891_v36 = vadd.f32 %v866_v3, %v712_v62  ;;  %v624_v6 = vpop.permute.xlu1 %623  ;;  %1446 = vmatprep.subr.mxu0 %v4272_v26 }
 0x171   : > { %v1370_v38 = vmul.f32 1.442695, %v1324_v4  ;;  %v1219_v43 = vmul.f32 %v4151_v7, %v4991_v50  ;;  %v686_v14 = vsub.f32 %v624_v6, %v4590_v51  ;;  %v531_v6 = vld [vmem:[%s4876_s20] sm:$0xff] }
 0x172   : > { %v1070_v23 = vadd.f32 %v1045_v56, %v891_v36 }
 0x173   : > { %4156 = vpow2.f32 %v1370_v38  ;;  %v1221_v12 = vsel %vm1220_vm9, %v4991_v50, %v1219_v43  ;;  %v711_v35 = vmul.f32 %v686_v14, %v686_v14  ;;  %v534_v43 = vld [vmem:[%s4876_s20 + $0x18] sm:$0xff]  ;;  %v2002_v14 = vld [vmem:[%s5647_s8] sm:$0xff] }
 0x174   : > { %v1224_v61 = vsel %vm1222_vm10, %v1223_v25, %v1221_v12  ;;  %4158 = vrsqrt.f32 %v1070_v23  ;;  %vm1199_vm0 = vcmp.eq.f32.partialorder %v1070_v23, inf  ;;  %v1202_v40 = vand.u32 2147483648, %v1070_v23  ;;  %v533_v25 = vld [vmem:[%s4876_s20 + $0x10] sm:$0xff]  ;;  %v535_v12 = vld [vmem:[%s4876_s20 + $0x20] sm:$0xff]  ;;  %2008 = vperm.xlu0 %4070, %v2002_v14  }
 0x175   : > { %v1273_v13 = vmul.f32 2e-05, %v1224_v61  ;;  %v786_v33 = vpop.permute.xlu1 %785  ;;  %vm1201_vm1 = vcmp.eq.f32.partialorder %v1070_v23, 0.0  ;;  %v538_v61 = vld [vmem:[%s4876_s20 + $0x38] sm:$0xff]  ;;  %v3377_v14 = vld [vmem:[#allocation3] sm:$0x1] }
 0x176   : > { %v840_v21 = vsub.f32 %v786_v33, %v4585_v49  ;;  %v539_v33 = vld [vmem:[%s4876_s20 + $0x40] sm:$0x1] }
 0x177   : > { %v4153_v15 = vpop.eup %4152  ;;  %v1298_v8 = vadd.f32 %v1273_v13, %v4991_v50  ;;  %v540_v13 = vld [vmem:[%s4876_s20 + $0x48] sm:$0x1] }
 0x178   : > { %v1205_v16 = vmul.f32 %v4153_v15, %v5001_v55  ;;  %v865_v20 = vmul.f32 %v840_v21, %v840_v21  ;;  %v2134_v21 = vld [vmem:[%s5649_s10 + $0x18] sm:$0xff] }
 0x179   : > { %v1323_v48 = vmul.f32 -25.0, %v1298_v8  ;;  %2152 = vperm.xlu1 %4071, %v2134_v21   ;;  %v1651_v15 = vld [vmem:[%s5645_s6 + $0x38] sm:$0xff]  ;;  %v2133_v8 = vld [vmem:[%s5649_s10 + $0x10] sm:$0xff] }
 0x17a   : > { %v4155_v1 = vpop.eup %4154  ;;  %v1207_v47 = vsel %vm1206_vm11, %v5001_v55, %v1205_v16  ;;  %v965_v51 = vpop.permute.xlu1 %964  ;;  %v890_v28 = vadd.f32 %v865_v20, %v711_v35  ;;  %1701 = vperm.xlu0 %4070, %v1651_v15   ;;  %v1650_v16 = vld [vmem:[%s5645_s6 + $0x30] sm:$0xff]  ;;  %v2131_v20 = vld [vmem:[%s5649_s10] sm:$0xff] }
 0x17b   : > { %v1368_v19 = vmul.f32 1.442695, %v1323_v48  ;;  %v1210_v49 = vsel %vm1208_vm13, %v1209_v17, %v1207_v47  ;;  %v1212_v45 = vmul.f32 %v4155_v1, %v1072_v59  ;;  %v1019_v50 = vsub.f32 %v965_v51, %v4593_v53  ;;  %v2132_v48 = vld [vmem:[%s5649_s10 + $0x8] sm:$0xff]  ;;  %v1648_v1 = vld [vmem:[%s5645_s6 + $0x20] sm:$0xff]  ;;  %v3556_v47 = vld [vmem:[%s5647_s8 + $0x38] sm:$0xff] }
 0x17c   : > { %v1271_v27 = vmul.f32 2e-05, %v1210_v49  ;;  %v1649_v17 = vld [vmem:[%s5645_s6 + $0x28] sm:$0xff]  ;;  %v3555_v35 = vld [vmem:[%s5647_s8 + $0x30] sm:$0xff]  ;;  %v1494_v49 = vld [vmem:[%s5642_s3] sm:$0xff] }
 0x17d   : > { %4160 = vpow2.f32 %v1368_v19  ;;  %v1214_v29 = vsel %vm1213_vm14, %v1072_v59, %v1212_v45  ;;  %v1044_v39 = vmul.f32 %v1019_v50, %v1019_v50  ;;  %2147 = vperm.xlu1 %4071, %v2133_v8   ;;  %v3554_v51 = vld [vmem:[%s5647_s8 + $0x28] sm:$0xff]  ;;  %v4174_v19 = vld [vmem:[%s4578_s16] sm:$0x7]  ;;  %3760 = vmatprep.mubr.msk.f32.mxu1 %vm1522_vm4, %v1494_v49  ;;  %s3402_s16 = scalar_lea.hbm %s5652_s13, %s3646_s0 }
 0x17e   : > { %v1296_v42 = vadd.f32 %v1271_v27, %v5001_v55  ;;  %v1217_v0 = vsel %vm1215_vm15, %v1216_v5, %v1214_v29  ;;  %1696 = vperm.xlu0 %4070, %v1650_v16   ;;  %v1495_v45 = vld [vmem:[%s5642_s3 + $0x8] sm:$0xff]  ;;  %v3553_v50 = vld [vmem:[%s5647_s8 + $0x20] sm:$0xff]  ;;  %v3568_v27 = vld [vmem:[%s5649_s10 + $0x38] sm:$0xff] }
 0x17f   : > { %v1272_v60 = vmul.f32 2e-05, %v1217_v0  ;;  %v1069_v44 = vadd.f32 %v1044_v39, %v890_v28  ;;  %v1655_v5 = vld [vmem:[%s5645_s6 + $0x58] sm:$0xff]  ;;  %v3567_v29 = vld [vmem:[%s5649_s10 + $0x30] sm:$0xff]  ;;  %v3566_v39 = vld [vmem:[%s5649_s10 + $0x28] sm:$0xff] }
 0x180   : > { %v4157_v30 = vpop.eup %4156  ;;  %v1321_v63 = vmul.f32 -25.0, %v1296_v42  ;;  %v1654_v28 = vld [vmem:[%s5645_s6 + $0x50] sm:$0xff]  ;;  %v1497_v0 = vld [vmem:[%s5642_s3 + $0x18] sm:$0xff] }
 0x181   : > { %v4159_v52 = vpop.eup %4158  ;;  %v1297_v9 = vadd.f32 %v1272_v60, %v1072_v59  ;;  %4162 = vrsqrt.f32 %v1069_v44  ;;  %1447 = vmatpush2.msra.mxu0 %v4157_v30  ;;  %vm1192_vm2 = vcmp.eq.f32.partialorder %v1069_v44, inf  ;;  %v1195_v37 = vand.u32 2147483648, %v1069_v44  ;;  %2142 = vperm.xlu1 %4071, %v2132_v48   ;;  %v1496_v42 = vld [vmem:[%s5642_s3 + $0x10] sm:$0xff]  ;;  %v1653_v60 = vld [vmem:[%s5645_s6 + $0x48] sm:$0xff]  ;;  %v1624_v30 = vld [vmem:[%s5644_s5] sm:$0xff] }
 0x182   : > { %v1198_v53 = vmul.f32 %v4159_v52, %v1070_v23  ;;  %1448 = vmatprep.subr.mxu0 %v4272_v26  ;;  %v1364_v31 = vmul.f32 1.442695, %v1321_v63  ;;  %vm1194_vm3 = vcmp.eq.f32.partialorder %v1069_v44, 0.0  ;;  %1691 = vperm.xlu0 %4070, %v1649_v17   ;;  %v1652_v52 = vld [vmem:[%s5645_s6 + $0x40] sm:$0xff]  ;;  %v3580_v63 = vld [vmem:[%s5647_s8 + $0x58] sm:$0xff] }
 0x183   : > { %v1322_v54 = vmul.f32 -25.0, %v1297_v9  ;;  %v3579_v9 = vld [vmem:[%s5647_s8 + $0x50] sm:$0xff] }
 0x184   : > { %v1200_v57 = vsel %vm1199_vm0, %v1070_v23, %v1198_v53  ;;  %v3578_v53 = vld [vmem:[%s5647_s8 + $0x48] sm:$0xff] }
 0x185   : > { %v1366_v22 = vmul.f32 1.442695, %v1322_v54  ;;  %v1203_v55 = vsel %vm1201_vm1, %v1202_v40, %v1200_v57  ;;  %2137 = vperm.xlu1 %4071, %v2131_v20   ;;  %v3577_v54 = vld [vmem:[%s5647_s8 + $0x40] sm:$0xff]  ;;  %v3592_v40 = vld [vmem:[%s5649_s10 + $0x58] sm:$0xff] }
 0x186   : > { %v1270_v2 = vmul.f32 2e-05, %v1203_v55  ;;  %1686 = vperm.xlu0 %4070, %v1648_v1   ;;  %v1659_v57 = vld [vmem:[%s5645_s6 + $0x78] sm:$0xff]  ;;  %v3590_v55 = vld [vmem:[%s5649_s10 + $0x48] sm:$0xff] }
 0x187   : > { %4164 = vpow2.f32 %v1366_v22  ;;  %v1658_v22 = vld [vmem:[%s5645_s6 + $0x70] sm:$0xff] }
 0x188   : > { %v1295_v58 = vadd.f32 %v1270_v2, %v1070_v23  ;;  %4166 = vpow2.f32 %v1364_v31  ;;  %v536_v23 = vld [vmem:[%s4876_s20 + $0x28] sm:$0xff]  ;;  %v3591_v31 = vld [vmem:[%s5649_s10 + $0x50] sm:$0xff] }
 0x189   : > { %2291 = vperm.xlu1 %4071, %v3556_v47   ;;  %v1657_v2 = vld [vmem:[%s5645_s6 + $0x68] sm:$0xff] }
 0x18a   : > { %v4161_v11 = vpop.eup %4160  ;;  %v1320_v32 = vmul.f32 -25.0, %v1295_v58  ;;  %2286 = vperm.xlu0 %4070, %v3555_v35   ;;  %v3589_v58 = vld [vmem:[%s5649_s10 + $0x40] sm:$0xff] }
 0x18b   : > { %1449 = vmatpush2.msra.mxu0 %v4161_v11  ;;  %v1656_v11 = vld [vmem:[%s5645_s6 + $0x60] sm:$0xff] }
 0x18c   : > { %v1362_v24 = vmul.f32 1.442695, %v1320_v32  ;;  %1450 = vmatprep.subr.mxu0 %v4272_v26  ;;  %v3604_v32 = vld [vmem:[%s5647_s8 + $0x78] sm:$0xff] }
 0x18d   : > { %2281 = vperm.xlu1 %4071, %v3554_v51  }
 0x18e   : > { %v4163_v34 = vpop.eup %4162  ;;  %4168 = vpow2.f32 %v1362_v24  ;;  %2276 = vperm.xlu0 %4070, %v3553_v50   ;;  %v3603_v24 = vld [vmem:[%s5647_s8 + $0x70] sm:$0xff] }
 0x18f   : > { %v1191_v59 = vmul.f32 %v4163_v34, %v1069_v44  ;;  %v3602_v34 = vld [vmem:[%s5647_s8 + $0x68] sm:$0xff] }
 0x191   : > { %v1193_v10 = vsel %vm1192_vm2, %v1069_v44, %v1191_v59  ;;  %2422 = vperm.xlu1 %4071, %v3568_v27   ;;  %v3601_v59 = vld [vmem:[%s5647_s8 + $0x60] sm:$0xff] }
 0x192   : > { %v1196_v41 = vsel %vm1194_vm3, %v1195_v37, %v1193_v10  ;;  %1721 = vperm.xlu0 %4070, %v1655_v5   ;;  %v3616_v37 = vld [vmem:[%s5649_s10 + $0x78] sm:$0xff]  ;;  %v1625_v5 = vld [vmem:[%s5644_s5 + $0x8] sm:$0xff] }
 0x193   : > { %v1269_v18 = vmul.f32 2e-05, %v1196_v41  ;;  %v1663_v10 = vld [vmem:[%s5645_s6 + $0x98] sm:$0xff]  ;;  %v3615_v41 = vld [vmem:[%s5649_s10 + $0x70] sm:$0xff] }
 0x194   : > { %v4165_v62 = vpop.eup %4164 }
 0x195   : > { %v1294_v3 = vadd.f32 %v1269_v18, %v1069_v44  ;;  %1451 = vmatpush2.msra.mxu0 %v4165_v62  ;;  %v4167_v56 = vpop.eup %4166  ;;  %2417 = vperm.xlu1 %4071, %v3567_v29   ;;  %v3565_v44 = vld [vmem:[%s5649_s10 + $0x20] sm:$0xff]  ;;  %v1662_v18 = vld [vmem:[%s5645_s6 + $0x90] sm:$0xff]  ;;  %v3614_v62 = vld [vmem:[%s5649_s10 + $0x68] sm:$0xff] }
 0x196   : > { %1452 = vmatprep.subr.mxu0 %v4272_v26  ;;  %1716 = vperm.xlu0 %4070, %v1654_v28   ;;  %v1626_v29 = vld [vmem:[%s5644_s5 + $0x10] sm:$0xff]  ;;  %v1627_v28 = vld [vmem:[%s5644_s5 + $0x18] sm:$0xff] }
 0x197   : > { %v1319_v4 = vmul.f32 -25.0, %v1294_v3  ;;  %1453 = vmatpush2.msra.mxu0 %v4167_v56  ;;  %v1661_v3 = vld [vmem:[%s5645_s6 + $0x88] sm:$0xff]  ;;  %v3613_v56 = vld [vmem:[%s5649_s10 + $0x60] sm:$0xff] }
 0x198   : > { %1454 = vmatprep.subr.mxu0 %v4272_v26 }
 0x199   : > { %v1360_v7 = vmul.f32 1.442695, %v1319_v4  ;;  %2412 = vperm.xlu1 %4071, %v3566_v39   ;;  %v1660_v4 = vld [vmem:[%s5645_s6 + $0x80] sm:$0xff] }
 0x19a   : > { %1711 = vperm.xlu0 %4070, %v1653_v60   ;;  %v1628_v39 = vld [vmem:[%s5644_s5 + $0x20] sm:$0xff]  ;;  %v1631_v60 = vld [vmem:[%s5644_s5 + $0x38] sm:$0xff] }
 0x19b   : > { %v4169_v36 = vpop.eup %4168  ;;  %4170 = vpow2.f32 %v1360_v7  ;;  %v3628_v7 = vld [vmem:[%s5647_s8 + $0x98] sm:$0xff] }
 0x19c   : > { %1455 = vmatpush2.msra.mxu0 %v4169_v36  ;;  %v3627_v36 = vld [vmem:[%s5647_s8 + $0x90] sm:$0xff] }
 0x19d   : > { %1456 = vmatprep.subr.mxu0 %v4272_v26  ;;  %v537_v26 = vld [vmem:[%s4876_s20 + $0x30] sm:$0xff]  ;;  %2407 = vperm.xlu1 %4071, %v3565_v44   ;;  %v1632_v44 = vld [vmem:[%s5644_s5 + $0x40] sm:$0xff] }
 0x19e   : > { %1706 = vperm.xlu0 %4070, %v1652_v52   ;;  %v1634_v52 = vld [vmem:[%s5644_s5 + $0x50] sm:$0xff] }
 0x1a1   : > { %2561 = vperm.xlu1 %4071, %v3580_v63   ;;  %v1635_v63 = vld [vmem:[%s5644_s5 + $0x58] sm:$0xff] }
 0x1a2   : > { %2556 = vperm.xlu0 %4070, %v3579_v9   ;;  %v1636_v9 = vld [vmem:[%s5644_s5 + $0x60] sm:$0xff] }
 0x1a5   : > { %2551 = vperm.xlu1 %4071, %v3578_v53   ;;  %v1637_v53 = vld [vmem:[%s5644_s5 + $0x68] sm:$0xff] }
 0x1a6   : > { %2546 = vperm.xlu0 %4070, %v3577_v54   ;;  %v1638_v54 = vld [vmem:[%s5644_s5 + $0x70] sm:$0xff] }
 0x1a8   : > { %v4171_v38 = vpop.eup %4170 }
 0x1a9   : > { %1457 = vmatpush2.msra.mxu0 %v4171_v38  ;;  %2692 = vperm.xlu1 %4071, %v3592_v40   ;;  %v3625_v38 = vld [vmem:[%s5647_s8 + $0x80] sm:$0xff]  ;;  %v1639_v40 = vld [vmem:[%s5644_s5 + $0x78] sm:$0xff] }
 0x1aa   : > { %1459 = vmatmul.mubr.f32.vlgmr.msra.gmra.mxu0 %v531_v6  ;;  %1741 = vperm.xlu0 %4070, %v1659_v57   ;;  %v3626_v6 = vld [vmem:[%s5647_s8 + $0x88] sm:$0xff]  ;;  %v1640_v57 = vld [vmem:[%s5644_s5 + $0x80] sm:$0xff] }
 0x1ab   : > { %3512 = vmatprep.mubr.msk.f32.mxu0 %vm1378_vm12, %v534_v43  ;;  %v3637_v43 = vld [vmem:[%s5649_s10 + $0x80] sm:$0xff] }
 0x1ad   : > { %2687 = vperm.xlu1 %4071, %v3591_v31   ;;  %v1641_v31 = vld [vmem:[%s5644_s5 + $0x88] sm:$0xff] }
 0x1ae   : > { %1464 = vmatmul.mubr.f32.gmra.mxu0 %v533_v25  ;;  %1736 = vperm.xlu0 %4070, %v1658_v22   ;;  %v3638_v25 = vld [vmem:[%s5649_s10 + $0x88] sm:$0xff]  ;;  %v1642_v22 = vld [vmem:[%s5644_s5 + $0x90] sm:$0xff] }
 0x1af   : > { %3513 = vmatprep.mubr.msk.f32.mxu0 %vm1378_vm12, %v536_v23  ;;  %v3639_v23 = vld [vmem:[%s5649_s10 + $0x90] sm:$0xff] }
 0x1b1   : > { %2682 = vperm.xlu1 %4071, %v3590_v55   ;;  %v1643_v55 = vld [vmem:[%s5644_s5 + $0x98] sm:$0xff] }
 0x1b2   : > { %1469 = vmatmul.mubr.f32.gmra.mxu0 %v535_v12  ;;  %1731 = vperm.xlu0 %4070, %v1657_v2   ;;  %v3640_v12 = vld [vmem:[%s5649_s10 + $0x98] sm:$0xff]  ;;  %v1994_v2 = vld [vmem:[%s5646_s7] sm:$0xff] }
 0x1b3   : > { %3514 = vmatprep.mubr.msk.f32.mxu0 %vm1378_vm12, %v538_v61  ;;  %v3340_v61 = vld [vmem:[%s5650_s11] sm:$0xff] }
 0x1b5   : > { %2677 = vperm.xlu1 %4071, %v3589_v58  }
 0x1b6   : > { %1474 = vmatmul.mubr.f32.gmra.mxu0 %v537_v26  ;;  %1726 = vperm.xlu0 %4070, %v1656_v11   ;;  %v3341_v26 = vld [vmem:[%s5650_s11 + $0x8] sm:$0xff]  ;;  %v1520_v11 = vpop.permute.xlu0 %1519 }
 0x1b7   : > { %3515 = vmatprep.mubr.msk.f32.mxu0 %vm1378_vm12, %v540_v13  ;;  %vm1535_vm12 = vcmask 1042432   ;;  %v3342_v13 = vld [vmem:[%s5650_s11 + $0x10] sm:$0xff] }
 0x1b8   : > { %3758 = vmatprep.subr.msk.mxu1 %vm1535_vm12, %v4174_v19 }
 0x1b9   : > { %3759 = vmatpush3.msk.msra.mxu1 %vm1535_vm12, %v4174_v19  ;;  %2831 = vperm.xlu1 %4071, %v3604_v32   ;;  %v1682_v32 = vpop.permute.xlu1 %1681 }
 0x1ba   : > { %1479 = vmatmul.mubr.f32.gmra.mxu0 %v539_v33  ;;  %3761 = vmatmul.mubr.msk.f32.vlgmr.msra.gmra.mxu1 %vm1522_vm4, %v1495_v45  ;;  %v3343_v33 = vld [vmem:[%s5650_s11 + $0x18] sm:$0xff] }
 0x1bb   : > { %3763 = vmatprep.mubr.msk.f32.mxu1 %vm1522_vm4, %v1496_v42  ;;  %2826 = vperm.xlu0 %4070, %v3603_v24   ;;  %v1629_v42 = vld [vmem:[%s5644_s5 + $0x28] sm:$0xff] }
 0x1bd   : > { %2821 = vperm.xlu1 %4071, %v3602_v34   ;;  %v1677_v34 = vpop.permute.xlu0 %1676 }
 0x1be   : > { %3764 = vmatmul.mubr.msk.f32.gmra.mxu1 %vm1522_vm4, %v1497_v0  ;;  %v1630_v0 = vld [vmem:[%s5644_s5 + $0x30] sm:$0xff] }
 0x1bf   : > { %3774 = vmatprep.mubr.msk.f32.mxu1 %vm1764_vm5, %v1624_v30  ;;  %2816 = vperm.xlu0 %4070, %v3601_v59   ;;  %v1633_v30 = vld [vmem:[%s5644_s5 + $0x48] sm:$0xff] }
 0x1c1   : > { %2962 = vperm.xlu1 %4071, %v3616_v37   ;;  %v1515_v37 = vpop.permute.xlu1 %1514 }
 0x1c3   : > { %1761 = vperm.xlu0 %4070, %v1663_v10  }
 0x1c5   : > { %2957 = vperm.xlu1 %4071, %v3615_v41   ;;  %v1672_v41 = vpop.permute.xlu0 %1671 }
 0x1c7   : > { %1756 = vperm.xlu0 %4070, %v1662_v18  }
 0x1c9   : > { %2952 = vperm.xlu1 %4071, %v3614_v62   ;;  %v1510_v62 = vpop.permute.xlu1 %1509 }
 0x1cb   : > { %1751 = vperm.xlu0 %4070, %v1661_v3  }
 0x1cd   : > { %2947 = vperm.xlu1 %4071, %v3613_v56  }
 0x1cf   : > { %1746 = vperm.xlu0 %4070, %v1660_v4  }
 0x1d1   : > { %3101 = vperm.xlu1 %4071, %v3628_v7  }
 0x1d3   : > { %3096 = vperm.xlu0 %4070, %v3627_v36  }
 0x1d5   : > { %3091 = vperm.xlu1 %4071, %v3626_v6   ;;  %v1667_v6 = vpop.permute.xlu0 %1666 }
 0x1d7   : > { %3086 = vperm.xlu0 %4070, %v3625_v38  }
 0x1d9   : > { %3217 = vperm.xlu1 %4071, %v3637_v43  }
 0x1db   : > { %3222 = vperm.xlu0 %4070, %v3638_v25  }
 0x1dd   : > { %3227 = vperm.xlu1 %4071, %v3639_v23  }
 0x1df   : > { %3232 = vperm.xlu0 %4070, %v3640_v12  }
 0x1e1   : > { %3346 = vperm.xlu1 %4071, %v3340_v61  }
 0x1e3   : > { %3351 = vperm.xlu0 %4070, %v3341_v26   ;;  %v1505_v26 = vpop.permute.xlu1 %1504 }
 0x1e5   : > { %3356 = vperm.xlu1 %4071, %v3342_v13  }
 0x1e7   : > { %3361 = vperm.xlu0 %4070, %v3343_v33  }
 0x1e9   : > { %3380 = vperm.xlu1 %4071, %v3377_v14  }
 0x26a   : > { %v1460_v21 = vpop.f32.mrf.mxu0 }
 0x26c   : > { %v1462_v15 = vpop.f32.mrf.mxu0 }
 0x26e   : > { %v1465_v8 = vpop.f32.mrf.mxu0 }
 0x270   : > { %v1467_v16 = vpop.f32.mrf.mxu0 }
 0x272   : > { %v1470_v48 = vpop.f32.mrf.mxu0 }
 0x274   : > { %v1472_v17 = vpop.f32.mrf.mxu0 }
 0x275   : > { %v1995_v17 = vld [vmem:[%s5646_s7 + $0x8] sm:$0xff] }
 0x276   : > { %v1475_v20 = vpop.f32.mrf.mxu0 }
 0x278   : > { %v1477_v1 = vpop.f32.mrf.mxu0 }
 0x279   : > { %v1997_v1 = vld [vmem:[%s5646_s7 + $0x18] sm:$0xff] }
 0x27a   : > { %v1480_v47 = vpop.f32.mrf.mxu0  ;;  %v3762_v58 = vpop.f32.mrf.mxu1 }
 0x27b   : > { %4172 = vrcp.f32 %v1480_v47  ;;  %v1611_v38 = vadd.f32 %v3762_v58, %v1510_v62  ;;  %v2123_v47 = vld [vmem:[%s5648_s9] sm:$0xff] }
 0x27c   : > { %v1482_v35 = vpop.f32.mrf.mxu0  ;;  %v1605_v24 = vpop.f32.mrf.mxu1 }
 0x27d   : > { %v1606_v13 = vadd.f32 %v1605_v24, %v1505_v26 }
 0x27e   : > { %v3765_v59 = vpop.f32.mrf.mxu1 }
 0x27f   : > { %v1621_v4 = vadd.f32 %v3765_v59, %v1520_v11  ;;  %v2124_v59 = vld [vmem:[%s5648_s9 + $0x8] sm:$0xff] }
 0x280   : > { %v1615_v10 = vpop.f32.mrf.mxu1 }
 0x281   : > { %v1616_v25 = vadd.f32 %v1615_v10, %v1515_v37  ;;  %v2125_v37 = vld [vmem:[%s5648_s9 + $0x10] sm:$0xff]  ;;  %v2126_v10 = vld [vmem:[%s5648_s9 + $0x18] sm:$0xff] }
 0x288   : > { %v4173_v51 = vpop.eup %4172 }
 0x289   : > { %v1489_v19 = vrot.slane %v4173_v51, %v4580_v46 }
 0x28b   : > { %v1493_v49 = vmul.f32 %v1489_v19, %v1475_v20  ;;  %v1492_v45 = vmul.f32 %v1489_v19, %v1470_v48  ;;  %v1491_v50 = vmul.f32 %v1489_v19, %v1465_v8  ;;  %v1490_v27 = vmul.f32 %v1489_v19, %v1460_v21  ;;  %v1996_v20 = vld [vmem:[%s5646_s7 + $0x10] sm:$0xff] }
 0x28d   : > { %3766 = vmatprep.subr.mxu1 %v1493_v49 }
 0x28e   : > { %3767 = vmatpush3.msra.mxu1 %v1493_v49 }
 0x28f   : > { %3768 = vmatprep.subr.mxu1 %v1492_v45 }
 0x290   : > { %3769 = vmatpush3.msra.mxu1 %v1492_v45 }
 0x291   : > { %3770 = vmatprep.subr.mxu1 %v1491_v50 }
 0x292   : > { %3771 = vmatpush3.msra.mxu1 %v1491_v50 }
 0x293   : > { %3772 = vmatprep.subr.mxu1 %v1490_v27 }
 0x294   : > { %3773 = vmatpush3.msra.mxu1 %v1490_v27 }
 0x295   : > { %3775 = vmatmul.mubr.msk.f32.vlgmr.msra.gmra.mxu1 %vm1764_vm5, %v1625_v5 }
 0x296   : > { %3777 = vmatprep.mubr.msk.f32.mxu1 %vm1764_vm5, %v1626_v29 }
 0x299   : > { %3778 = vmatmul.mubr.msk.f32.gmra.mxu1 %vm1764_vm5, %v1627_v28 }
 0x29a   : > { %3780 = vmatprep.mubr.msk.f32.mxu1 %vm1764_vm5, %v1628_v39 }
 0x29d   : > { %3781 = vmatmul.mubr.msk.f32.gmra.mxu1 %vm1764_vm5, %v1629_v42 }
 0x29e   : > { %3783 = vmatprep.mubr.msk.f32.mxu1 %vm1764_vm5, %v1630_v0 }
 0x2a1   : > { %3784 = vmatmul.mubr.msk.f32.gmra.mxu1 %vm1764_vm5, %v1631_v60 }
 0x2a2   : > { %3786 = vmatprep.mubr.msk.f32.mxu1 %vm1764_vm5, %v1632_v44 }
 0x2a5   : > { %3787 = vmatmul.mubr.msk.f32.gmra.mxu1 %vm1764_vm5, %v1633_v30 }
 0x2a6   : > { %3789 = vmatprep.mubr.msk.f32.mxu1 %vm1764_vm5, %v1634_v52  ;;  %v2024_v52 = vpop.permute.xlu1 %2023 }
 0x2a9   : > { %3790 = vmatmul.mubr.msk.f32.gmra.mxu1 %vm1764_vm5, %v1635_v63 }
 0x2aa   : > { %3792 = vmatprep.mubr.msk.f32.mxu1 %vm1764_vm5, %v1636_v9  ;;  %v2019_v9 = vpop.permute.xlu0 %2018 }
 0x2ad   : > { %3793 = vmatmul.mubr.msk.f32.gmra.mxu1 %vm1764_vm5, %v1637_v53 }
 0x2ae   : > { %3795 = vmatprep.mubr.msk.f32.mxu1 %vm1764_vm5, %v1638_v54  ;;  %v2009_v58 = vpop.permute.xlu0 %2008 }
 0x2b1   : > { %3796 = vmatmul.mubr.msk.f32.gmra.mxu1 %vm1764_vm5, %v1639_v40 }
 0x2b2   : > { %3798 = vmatprep.mubr.msk.f32.mxu1 %vm1764_vm5, %v1640_v57  ;;  %v2014_v57 = vpop.permute.xlu1 %2013  ;;  %v1702_v62 = vpop.permute.xlu0 %1701 }
 0x2b5   : > { %3799 = vmatmul.mubr.msk.f32.gmra.mxu1 %vm1764_vm5, %v1641_v31 }
 0x2b6   : > { %3801 = vmatprep.mubr.msk.f32.mxu1 %vm1764_vm5, %v1642_v22 }
 0x2b9   : > { %3802 = vmatmul.mubr.msk.f32.gmra.mxu1 %vm1764_vm5, %v1643_v55 }
 0x2ba   : > { %3812 = vmatprep.mubr.msk.f32.mxu1 %vm1764_vm5, %v1994_v2 }
 0x355   : > { %v3776_v18 = vpop.f32.mrf.mxu1 }
 0x356   : > { %v1897_v7 = vadd.f32 %v3776_v18, %v1672_v41  ;;  %v3549_v41 = vld [vmem:[%s5646_s7 + $0x20] sm:$0xff]  ;;  %v2153_v18 = vpop.permute.xlu1 %2152 }
 0x357   : > { %v1891_v3 = vpop.f32.mrf.mxu1 }
 0x358   : > { %v1892_v23 = vadd.f32 %v1891_v3, %v1667_v6  ;;  %v5321_v33 = vadd.f32 %v1897_v7, %v1611_v38 }
 0x359   : > { %v3779_v56 = vpop.f32.mrf.mxu1 }
 0x35a   : > { %v1907_v36 = vadd.f32 %v3779_v56, %v1682_v32  ;;  %v5326_v15 = vadd.f32 %v1892_v23, %v1606_v13  ;;  %v1999_v16 = vmax.f32 %v5321_v33, 0.0  ;;  %v2148_v3 = vpop.permute.xlu1 %2147  ;;  %v1697_v56 = vpop.permute.xlu0 %1696 }
 0x35b   : > { %v1901_v43 = vpop.f32.mrf.mxu1 }
 0x35c   : > { %v5319_v12 = vadd.f32 %v1907_v36, %v1621_v4  ;;  %v1902_v61 = vadd.f32 %v1901_v43, %v1677_v34  ;;  %v1998_v48 = vmax.f32 %v5326_v15, 0.0 }
 0x35d   : > { %v5347_v35 = vpop.f32.mrf.mxu1 }
 0x35e   : > { %v5323_v14 = vadd.f32 %v1902_v61, %v1616_v25  ;;  %v2001_v21 = vmax.f32 %v5319_v12, 0.0  ;;  %v2143_v4 = vpop.permute.xlu1 %2142  ;;  %v1692_v6 = vpop.permute.xlu0 %1691 }
 0x35f   : > { %v5349_v51 = vpop.f32.mrf.mxu1 }
 0x360   : > { %3804 = vmatprep.subr.mxu1 %v2001_v21  ;;  %v2000_v8 = vmax.f32 %v5323_v14, 0.0 }
 0x361   : > { %3805 = vmatpush3.msra.mxu1 %v2001_v21  ;;  %v3785_v19 = vpop.f32.mrf.mxu1 }
 0x362   : > { %3806 = vmatprep.subr.mxu1 %v2000_v8  ;;  %v2138_v43 = vpop.permute.xlu1 %2137  ;;  %v1927_v13 = vadd.f32 %v3785_v19, %v1702_v62  ;;  %v3562_v62 = vld [vmem:[%s5648_s9 + $0x28] sm:$0xff] }
 0x363   : > { %3807 = vmatpush3.msra.mxu1 %v2000_v8  ;;  %v5351_v49 = vpop.f32.mrf.mxu1 }
 0x364   : > { %3808 = vmatprep.subr.mxu1 %v1999_v16 }
 0x365   : > { %3809 = vmatpush3.msra.mxu1 %v1999_v16  ;;  %v5353_v45 = vpop.f32.mrf.mxu1 }
 0x366   : > { %3810 = vmatprep.subr.mxu1 %v1998_v48 }
 0x367   : > { %3811 = vmatpush3.msra.mxu1 %v1998_v48  ;;  %v5355_v50 = vpop.f32.mrf.mxu1  ;;  %v1917_v48 = vadd.f32 %v5347_v35, %v1692_v6 }
 0x368   : > { %3813 = vmatmul.mubr.msk.f32.vlgmr.msra.gmra.mxu1 %vm1764_vm5, %v1995_v17  ;;  %v1922_v17 = vadd.f32 %v5351_v49, %v1697_v56  ;;  %v3551_v49 = vld [vmem:[%s5646_s7 + $0x30] sm:$0xff]  ;;  %v3564_v56 = vld [vmem:[%s5648_s9 + $0x38] sm:$0xff] }
 0x369   : > { %3815 = vmatprep.mubr.msk.f32.mxu1 %vm1764_vm5, %v1996_v20  ;;  %v5357_v27 = vpop.f32.mrf.mxu1 }
 0x36b   : > { %v5359_v5 = vpop.f32.mrf.mxu1 }
 0x36c   : > { %3816 = vmatmul.mubr.msk.f32.gmra.mxu1 %vm1764_vm5, %v1997_v1 }
 0x36d   : > { %3826 = vmatprep.mubr.msk.f32.mxu1 %vm1764_vm5, %v2123_v47  ;;  %v5361_v29 = vpop.f32.mrf.mxu1 }
 0x36f   : > { %v5363_v28 = vpop.f32.mrf.mxu1 }
 0x371   : > { %v5365_v39 = vpop.f32.mrf.mxu1 }
 0x373   : > { %v5367_v42 = vpop.f32.mrf.mxu1 }
 0x375   : > { %v5369_v0 = vpop.f32.mrf.mxu1 }
 0x377   : > { %v5371_v60 = vpop.f32.mrf.mxu1 }
 0x379   : > { %v5373_v44 = vpop.f32.mrf.mxu1 }
 0x37b   : > { %v5375_v30 = vpop.f32.mrf.mxu1 }
 0x428   : > { %v3814_v63 = vpop.f32.mrf.mxu1 }
 0x429   : > { %v2110_v22 = vadd.f32 %v3814_v63, %v2014_v57 }
 0x42a   : > { %v2104_v53 = vpop.f32.mrf.mxu1 }
 0x42b   : > { %v2105_v11 = vadd.f32 %v2104_v53, %v2009_v58  ;;  %v2128_v24 = vmax.f32 %v2110_v22, 0.0  ;;  %v3552_v53 = vld [vmem:[%s5646_s7 + $0x38] sm:$0xff] }
 0x42c   : > { %v3817_v54 = vpop.f32.mrf.mxu1 }
 0x42d   : > { %v2120_v40 = vadd.f32 %v3817_v54, %v2024_v52  ;;  %v2127_v34 = vmax.f32 %v2105_v11, 0.0  ;;  %v1687_v52 = vpop.permute.xlu0 %1686  ;;  %v3561_v54 = vld [vmem:[%s5648_s9 + $0x20] sm:$0xff] }
 0x42e   : > { %v2114_v31 = vpop.f32.mrf.mxu1  ;;  %v1912_v63 = vadd.f32 %v5349_v51, %v1687_v52  ;;  %v3550_v51 = vld [vmem:[%s5646_s7 + $0x28] sm:$0xff]  ;;  %3854 = vmatprep.mubr.msk.f32.mxu0 %vm1764_vm5, %v3561_v54  ;;  %v3576_v54 = vld [vmem:[%s5646_s7 + $0x58] sm:$0xff] }
 0x42f   : > { %v2130_v55 = vmax.f32 %v2120_v40, 0.0  ;;  %v2115_v2 = vadd.f32 %v2114_v31, %v2019_v9  ;;  %v2292_v40 = vpop.permute.xlu1 %2291 }
 0x431   : > { %v2129_v32 = vmax.f32 %v2115_v2, 0.0  ;;  %3818 = vmatprep.subr.mxu1 %v2130_v55  ;;  %v2287_v31 = vpop.permute.xlu0 %2286 }
 0x432   : > { %3819 = vmatpush3.msra.mxu1 %v2130_v55 }
 0x433   : > { %3820 = vmatprep.subr.mxu1 %v2129_v32  ;;  %v2282_v58 = vpop.permute.xlu1 %2281 }
 0x434   : > { %3821 = vmatpush3.msra.mxu1 %v2129_v32 }
 0x435   : > { %3822 = vmatprep.subr.mxu1 %v2128_v24 }
 0x436   : > { %3823 = vmatpush3.msra.mxu1 %v2128_v24 }
 0x437   : > { %3824 = vmatprep.subr.mxu1 %v2127_v34 }
 0x438   : > { %3825 = vmatpush3.msra.mxu1 %v2127_v34 }
 0x439   : > { %3827 = vmatmul.mubr.msk.f32.vlgmr.msra.gmra.mxu1 %vm1764_vm5, %v2124_v59  ;;  %v2277_v59 = vpop.permute.xlu0 %2276 }
 0x43a   : > { %3829 = vmatprep.mubr.msk.f32.mxu1 %vm1764_vm5, %v2125_v37 }
 0x43d   : > { %3830 = vmatmul.mubr.msk.f32.gmra.mxu1 %vm1764_vm5, %v2126_v10 }
 0x43e   : > { %3840 = vmatprep.mubr.msk.f32.mxu1 %vm1764_vm5, %v3549_v41 }
 0x4f9   : > { %v3828_v7 = vpop.f32.mrf.mxu1 }
 0x4fa   : > { %v2239_v38 = vadd.f32 %v3828_v7, %v2143_v4  ;;  %v3573_v4 = vld [vmem:[%s5646_s7 + $0x40] sm:$0xff]  ;;  %v2423_v7 = vpop.permute.xlu1 %2422 }
 0x4fb   : > { %v2233_v36 = vpop.f32.mrf.mxu1 }
 0x4fc   : > { %v2234_v23 = vadd.f32 %v2233_v36, %v2138_v43  ;;  %v2253_v21 = vadd.f32 %v2239_v38, %v5321_v33  ;;  %v1722_v36 = vpop.permute.xlu0 %1721 }
 0x4fd   : > { %v3831_v25 = vpop.f32.mrf.mxu1 }
 0x4fe   : > { %v2249_v61 = vadd.f32 %v3831_v25, %v2153_v18  ;;  %v2252_v20 = vadd.f32 %v2234_v23, %v5326_v15  ;;  %v5402_v9 = vadd.f32 %v2253_v21, %v1917_v48  ;;  %v2418_v6 = vpop.permute.xlu1 %2417 }
 0x4ff   : > { %v2243_v26 = vpop.f32.mrf.mxu1 }
 0x500   : > { %v2255_v8 = vadd.f32 %v2249_v61, %v5319_v12  ;;  %v2244_v16 = vadd.f32 %v2243_v26, %v2148_v3  ;;  %v5407_v33 = vadd.f32 %v2252_v20, %v1912_v63  ;;  %v2266_v15 = vmax.f32 %v5402_v9, 0.0  ;;  %v3563_v3 = vld [vmem:[%s5648_s9 + $0x30] sm:$0xff]  ;;  %v1717_v38 = vpop.permute.xlu0 %1716 }
 0x502   : > { %v5398_v1 = vadd.f32 %v2255_v8, %v1927_v13  ;;  %v2254_v47 = vadd.f32 %v2244_v16, %v5323_v14  ;;  %v2265_v14 = vmax.f32 %v5407_v33, 0.0  ;;  %v2413_v43 = vpop.permute.xlu1 %2412 }
 0x504   : > { %v5404_v19 = vadd.f32 %v2254_v47, %v1922_v17  ;;  %v2268_v12 = vmax.f32 %v5398_v1, 0.0  ;;  %v1712_v61 = vpop.permute.xlu0 %1711  ;;  %v1947_v17 = vadd.f32 %v5357_v27, %v1722_v36 }
 0x505   : > { %v1937_v63 = vadd.f32 %v5353_v45, %v1712_v61 }
 0x506   : > { %3832 = vmatprep.subr.mxu1 %v2268_v12  ;;  %v2267_v35 = vmax.f32 %v5404_v19, 0.0  ;;  %v2408_v13 = vpop.permute.xlu1 %2407 }
 0x507   : > { %3833 = vmatpush3.msra.mxu1 %v2268_v12  ;;  %v1942_v12 = vadd.f32 %v5359_v5, %v1717_v38 }
 0x508   : > { %3834 = vmatprep.subr.mxu1 %v2267_v35 }
 0x509   : > { %3835 = vmatpush3.msra.mxu1 %v2267_v35 }
 0x50a   : > { %3836 = vmatprep.subr.mxu1 %v2266_v15 }
 0x50b   : > { %3837 = vmatpush3.msra.mxu1 %v2266_v15 }
 0x50c   : > { %3838 = vmatprep.subr.mxu1 %v2265_v14 }
 0x50d   : > { %3839 = vmatpush3.msra.mxu1 %v2265_v14 }
 0x50e   : > { %3841 = vmatmul.mubr.msk.f32.vlgmr.msra.gmra.mxu1 %vm1764_vm5, %v3550_v51  ;;  %v1707_v51 = vpop.permute.xlu0 %1706 }
 0x50f   : > { %3843 = vmatprep.mubr.msk.f32.mxu1 %vm1764_vm5, %v3551_v49  ;;  %v1932_v49 = vadd.f32 %v5355_v50, %v1707_v51  ;;  %v3574_v50 = vld [vmem:[%s5646_s7 + $0x48] sm:$0xff] }
 0x512   : > { %3844 = vmatmul.mubr.msk.f32.gmra.mxu1 %vm1764_vm5, %v3552_v53 }
 0x513   : > { %3868 = vmatprep.mubr.msk.f32.mxu1 %vm1764_vm5, %v3573_v4  ;;  %v3588_v4 = vld [vmem:[%s5648_s9 + $0x58] sm:$0xff] }
 0x5ce   : > { %v3842_v57 = vpop.f32.mrf.mxu1 }
 0x5cf   : > { %v2378_v32 = vadd.f32 %v3842_v57, %v2282_v58  ;;  %v2562_v57 = vpop.permute.xlu1 %2561 }
 0x5d0   : > { %v2372_v22 = vpop.f32.mrf.mxu1 }
 0x5d1   : > { %v2373_v37 = vadd.f32 %v2372_v22, %v2277_v59  ;;  %v2397_v41 = vmax.f32 %v2378_v32, 0.0  ;;  %v2557_v22 = vpop.permute.xlu0 %2556 }
 0x5d2   : > { %v3845_v55 = vpop.f32.mrf.mxu1 }
 0x5d3   : > { %v2388_v2 = vadd.f32 %v3845_v55, %v2292_v40  ;;  %v2396_v18 = vmax.f32 %v2373_v37, 0.0  ;;  %v3585_v40 = vld [vmem:[%s5648_s9 + $0x40] sm:$0xff] }
 0x5d4   : > { %v2382_v11 = vpop.f32.mrf.mxu1 }
 0x5d5   : > { %v2399_v24 = vmax.f32 %v2388_v2, 0.0  ;;  %v2383_v34 = vadd.f32 %v2382_v11, %v2287_v31  ;;  %v2552_v11 = vpop.permute.xlu1 %2551  ;;  %v2547_v37 = vpop.permute.xlu0 %2546 }
 0x5d7   : > { %v2398_v10 = vmax.f32 %v2383_v34, 0.0  ;;  %3846 = vmatprep.subr.mxu0 %v2399_v24 }
 0x5d8   : > { %3847 = vmatpush3.msra.mxu0 %v2399_v24 }
 0x5d9   : > { %3848 = vmatprep.subr.mxu0 %v2398_v10  ;;  %v2693_v36 = vpop.permute.xlu1 %2692 }
 0x5da   : > { %3849 = vmatpush3.msra.mxu0 %v2398_v10 }
 0x5db   : > { %3850 = vmatprep.subr.mxu0 %v2397_v41 }
 0x5dc   : > { %3851 = vmatpush3.msra.mxu0 %v2397_v41 }
 0x5dd   : > { %3852 = vmatprep.subr.mxu0 %v2396_v18  ;;  %v2688_v38 = vpop.permute.xlu1 %2687 }
 0x5de   : > { %3853 = vmatpush3.msra.mxu0 %v2396_v18 }
 0x5df   : > { %3855 = vmatmul.mubr.msk.f32.vlgmr.msra.gmra.mxu0 %vm1764_vm5, %v3562_v62 }
 0x5e0   : > { %3857 = vmatprep.mubr.msk.f32.mxu0 %vm1764_vm5, %v3563_v3  ;;  %v3586_v3 = vld [vmem:[%s5648_s9 + $0x48] sm:$0xff] }
 0x5e3   : > { %3858 = vmatmul.mubr.msk.f32.gmra.mxu0 %vm1764_vm5, %v3564_v56  ;;  %v3587_v56 = vld [vmem:[%s5648_s9 + $0x50] sm:$0xff] }
 0x5e4   : > { %3882 = vmatprep.mubr.msk.f32.mxu0 %vm1764_vm5, %v3585_v40 }
 0x69f   : > { %v3856_v25 = vpop.f32.mrf.mxu0 }
 0x6a0   : > { %v2509_v26 = vadd.f32 %v3856_v25, %v2413_v43  ;;  %v2683_v25 = vpop.permute.xlu1 %2682 }
 0x6a1   : > { %v2503_v23 = vpop.f32.mrf.mxu0 }
 0x6a2   : > { %v2504_v8 = vadd.f32 %v2503_v23, %v2408_v13  ;;  %v2523_v20 = vadd.f32 %v2509_v26, %v5402_v9 }
 0x6a3   : > { %v3859_v21 = vpop.f32.mrf.mxu0 }
 0x6a4   : > { %v2519_v16 = vadd.f32 %v3859_v21, %v2423_v7  ;;  %v2522_v35 = vadd.f32 %v2504_v8, %v5407_v33  ;;  %v5454_v53 = vadd.f32 %v2523_v20, %v1937_v63  ;;  %v3575_v33 = vld [vmem:[%s5646_s7 + $0x50] sm:$0xff]  ;;  %v3597_v7 = vld [vmem:[%s5646_s7 + $0x60] sm:$0xff]  ;;  %v2678_v21 = vpop.permute.xlu1 %2677 }
 0x6a5   : > { %v2513_v48 = vpop.f32.mrf.mxu0 }
 0x6a6   : > { %v2525_v47 = vadd.f32 %v2519_v16, %v5398_v1  ;;  %v2514_v52 = vadd.f32 %v2513_v48, %v2418_v6  ;;  %v5459_v9 = vadd.f32 %v2522_v35, %v1932_v49  ;;  %v2536_v5 = vmax.f32 %v5454_v53, 0.0  ;;  %v1742_v6 = vpop.permute.xlu0 %1741 }
 0x6a7   : > { %v1967_v20 = vadd.f32 %v5365_v39, %v1742_v6 }
 0x6a8   : > { %v5450_v15 = vadd.f32 %v2525_v47, %v1947_v17  ;;  %v2524_v14 = vadd.f32 %v2514_v52, %v5404_v19  ;;  %v2535_v19 = vmax.f32 %v5459_v9, 0.0 }
 0x6aa   : > { %v5456_v27 = vadd.f32 %v2524_v14, %v1942_v12  ;;  %v2538_v1 = vmax.f32 %v5450_v15, 0.0  ;;  %v1737_v43 = vpop.permute.xlu0 %1736 }
 0x6ab   : > { %v1962_v35 = vadd.f32 %v5367_v42, %v1737_v43 }
 0x6ac   : > { %3860 = vmatprep.subr.mxu1 %v2538_v1  ;;  %v2537_v45 = vmax.f32 %v5456_v27, 0.0 }
 0x6ad   : > { %3861 = vmatpush3.msra.mxu1 %v2538_v1 }
 0x6ae   : > { %3862 = vmatprep.subr.mxu1 %v2537_v45  ;;  %v1732_v26 = vpop.permute.xlu0 %1731 }
 0x6af   : > { %3863 = vmatpush3.msra.mxu1 %v2537_v45  ;;  %v1957_v12 = vadd.f32 %v5361_v29, %v1732_v26 }
 0x6b0   : > { %3864 = vmatprep.subr.mxu1 %v2536_v5 }
 0x6b1   : > { %3865 = vmatpush3.msra.mxu1 %v2536_v5 }
 0x6b2   : > { %3866 = vmatprep.subr.mxu1 %v2535_v19  ;;  %v1727_v1 = vpop.permute.xlu0 %1726 }
 0x6b3   : > { %3867 = vmatpush3.msra.mxu1 %v2535_v19  ;;  %v1952_v45 = vadd.f32 %v5363_v28, %v1727_v1  ;;  %v3598_v28 = vld [vmem:[%s5646_s7 + $0x68] sm:$0xff]  ;;  %v3600_v19 = vld [vmem:[%s5646_s7 + $0x78] sm:$0xff] }
 0x6b4   : > { %3869 = vmatmul.mubr.msk.f32.vlgmr.msra.gmra.mxu1 %vm1764_vm5, %v3574_v50  ;;  %v3609_v50 = vld [vmem:[%s5648_s9 + $0x60] sm:$0xff] }
 0x6b5   : > { %3871 = vmatprep.mubr.msk.f32.mxu1 %vm1764_vm5, %v3575_v33  ;;  %v2832_v33 = vpop.permute.xlu1 %2831 }
 0x6b6   : > { %v2827_v40 = vpop.permute.xlu0 %2826 }
 0x6b8   : > { %3872 = vmatmul.mubr.msk.f32.gmra.mxu1 %vm1764_vm5, %v3576_v54 }
 0x6b9   : > { %3896 = vmatprep.mubr.msk.f32.mxu1 %vm1764_vm5, %v3597_v7 }
 0x774   : > { %v3870_v31 = vpop.f32.mrf.mxu1 }
 0x775   : > { %v2648_v24 = vadd.f32 %v3870_v31, %v2552_v11 }
 0x776   : > { %v2642_v55 = vpop.f32.mrf.mxu1 }
 0x777   : > { %v2643_v10 = vadd.f32 %v2642_v55, %v2547_v37  ;;  %v2667_v18 = vmax.f32 %v2648_v24, 0.0  ;;  %v2822_v55 = vpop.permute.xlu1 %2821  ;;  %v2817_v24 = vpop.permute.xlu0 %2816 }
 0x778   : > { %v3873_v2 = vpop.f32.mrf.mxu1 }
 0x779   : > { %v2658_v58 = vadd.f32 %v3873_v2, %v2562_v57  ;;  %v2666_v62 = vmax.f32 %v2643_v10, 0.0 }
 0x77a   : > { %v2652_v32 = vpop.f32.mrf.mxu1 }
 0x77b   : > { %v2669_v34 = vmax.f32 %v2658_v58, 0.0  ;;  %v2653_v59 = vadd.f32 %v2652_v32, %v2557_v22 }
 0x77d   : > { %v2668_v41 = vmax.f32 %v2653_v59, 0.0  ;;  %3874 = vmatprep.subr.mxu0 %v2669_v34 }
 0x77e   : > { %3875 = vmatpush3.msra.mxu0 %v2669_v34 }
 0x77f   : > { %3876 = vmatprep.subr.mxu0 %v2668_v41 }
 0x780   : > { %3877 = vmatpush3.msra.mxu0 %v2668_v41  ;;  %v3610_v41 = vld [vmem:[%s5648_s9 + $0x68] sm:$0xff] }
 0x781   : > { %3878 = vmatprep.subr.mxu0 %v2667_v18 }
 0x782   : > { %3879 = vmatpush3.msra.mxu0 %v2667_v18  ;;  %v3611_v18 = vld [vmem:[%s5648_s9 + $0x70] sm:$0xff] }
 0x783   : > { %3880 = vmatprep.subr.mxu0 %v2666_v62 }
 0x784   : > { %3881 = vmatpush3.msra.mxu0 %v2666_v62  ;;  %v3612_v62 = vld [vmem:[%s5648_s9 + $0x78] sm:$0xff] }
 0x785   : > { %3883 = vmatmul.mubr.msk.f32.vlgmr.msra.gmra.mxu0 %vm1764_vm5, %v3586_v3  ;;  %v3621_v3 = vld [vmem:[%s5646_s7 + $0x80] sm:$0xff] }
 0x786   : > { %3885 = vmatprep.mubr.msk.f32.mxu0 %vm1764_vm5, %v3587_v56  ;;  %v2963_v56 = vpop.permute.xlu1 %2962 }
 0x789   : > { %3886 = vmatmul.mubr.msk.f32.gmra.mxu0 %vm1764_vm5, %v3588_v4  ;;  %v1762_v4 = vpop.permute.xlu0 %1761 }
 0x78a   : > { %3910 = vmatprep.mubr.msk.f32.mxu0 %vm1764_vm5, %v3609_v50  ;;  %v2958_v7 = vpop.permute.xlu1 %2957 }
 0x78e   : > { %v2953_v6 = vpop.permute.xlu1 %2952 }
 0x845   : > { %v3884_v23 = vpop.f32.mrf.mxu0 }
 0x846   : > { %v2779_v13 = vadd.f32 %v3884_v23, %v2683_v25 }
 0x847   : > { %v2773_v61 = vpop.f32.mrf.mxu0 }
 0x848   : > { %v2774_v16 = vadd.f32 %v2773_v61, %v2678_v21  ;;  %v2793_v47 = vadd.f32 %v2779_v13, %v5454_v53  ;;  %v2948_v61 = vpop.permute.xlu1 %2947 }
 0x849   : > { %v3887_v8 = vpop.f32.mrf.mxu0 }
 0x84a   : > { %v2789_v48 = vadd.f32 %v3887_v8, %v2693_v36  ;;  %v2792_v14 = vadd.f32 %v2774_v16, %v5459_v9  ;;  %v5506_v5 = vadd.f32 %v2793_v47, %v1957_v12  ;;  %v3599_v9 = vld [vmem:[%s5646_s7 + $0x70] sm:$0xff]  ;;  %v1757_v36 = vpop.permute.xlu0 %1756  ;;  %v1987_v16 = vadd.f32 %v5373_v44, %v1762_v4 }
 0x84b   : > { %v2783_v17 = vpop.f32.mrf.mxu0 }
 0x84c   : > { %v2795_v52 = vadd.f32 %v2789_v48, %v5450_v15  ;;  %v2784_v63 = vadd.f32 %v2783_v17, %v2688_v38  ;;  %v5511_v53 = vadd.f32 %v2792_v14, %v1952_v45  ;;  %v2806_v42 = vmax.f32 %v5506_v5, 0.0 }
 0x84e   : > { %v5502_v51 = vadd.f32 %v2795_v52, %v1967_v20  ;;  %v2794_v49 = vadd.f32 %v2784_v63, %v5456_v27  ;;  %v2805_v27 = vmax.f32 %v5511_v53, 0.0  ;;  %v1752_v25 = vpop.permute.xlu0 %1751  ;;  %v1982_v52 = vadd.f32 %v5375_v30, %v1757_v36 }
 0x84f   : > { %v1977_v47 = vadd.f32 %v5369_v0, %v1752_v25 }
 0x850   : > { %v5508_v39 = vadd.f32 %v2794_v49, %v1962_v35  ;;  %v2808_v15 = vmax.f32 %v5502_v51, 0.0 }
 0x852   : > { %3888 = vmatprep.subr.mxu1 %v2808_v15  ;;  %v2807_v29 = vmax.f32 %v5508_v39, 0.0  ;;  %v1747_v14 = vpop.permute.xlu0 %1746 }
 0x853   : > { %3889 = vmatpush3.msra.mxu1 %v2808_v15  ;;  %v1972_v49 = vadd.f32 %v5371_v60, %v1747_v14  ;;  %v3622_v60 = vld [vmem:[%s5646_s7 + $0x88] sm:$0xff]  ;;  %v3624_v15 = vld [vmem:[%s5646_s7 + $0x98] sm:$0xff] }
 0x854   : > { %3890 = vmatprep.subr.mxu1 %v2807_v29 }
 0x855   : > { %3891 = vmatpush3.msra.mxu1 %v2807_v29  ;;  %v3102_v29 = vpop.permute.xlu1 %3101 }
 0x856   : > { %3892 = vmatprep.subr.mxu1 %v2806_v42 }
 0x857   : > { %3893 = vmatpush3.msra.mxu1 %v2806_v42 }
 0x858   : > { %3894 = vmatprep.subr.mxu1 %v2805_v27 }
 0x859   : > { %3895 = vmatpush3.msra.mxu1 %v2805_v27  ;;  %v3097_v27 = vpop.permute.xlu0 %3096  ;;  %v3092_v50 = vpop.permute.xlu1 %3091 }
 0x85a   : > { %3897 = vmatmul.mubr.msk.f32.vlgmr.msra.gmra.mxu1 %vm1764_vm5, %v3598_v28 }
 0x85b   : > { %3899 = vmatprep.mubr.msk.f32.mxu1 %vm1764_vm5, %v3599_v9 }
 0x85e   : > { %3900 = vmatmul.mubr.msk.f32.gmra.mxu1 %vm1764_vm5, %v3600_v19 }
 0x85f   : > { %3924 = vmatprep.mubr.msk.f32.mxu1 %vm1764_vm5, %v3621_v3 }
 0x91a   : > { %v3898_v54 = vpop.f32.mrf.mxu1 }
 0x91b   : > { %v2918_v58 = vadd.f32 %v3898_v54, %v2822_v55 }
 0x91c   : > { %v2912_v57 = vpop.f32.mrf.mxu1 }
 0x91d   : > { %v2913_v34 = vadd.f32 %v2912_v57, %v2817_v24  ;;  %v2937_v37 = vmax.f32 %v2918_v58, 0.0  ;;  %v3636_v24 = vld [vmem:[%s5648_s9 + $0x98] sm:$0xff] }
 0x91e   : > { %v3901_v31 = vpop.f32.mrf.mxu1 }
 0x91f   : > { %v2928_v22 = vadd.f32 %v3901_v31, %v2832_v33  ;;  %v2936_v10 = vmax.f32 %v2913_v34, 0.0  ;;  %v3087_v31 = vpop.permute.xlu0 %3086  ;;  %v3218_v34 = vpop.permute.xlu1 %3217 }
 0x920   : > { %v2922_v2 = vpop.f32.mrf.mxu1 }
 0x921   : > { %v2939_v11 = vmax.f32 %v2928_v22, 0.0  ;;  %v2923_v32 = vadd.f32 %v2922_v2, %v2827_v40 }
 0x923   : > { %v2938_v59 = vmax.f32 %v2923_v32, 0.0  ;;  %3902 = vmatprep.subr.mxu0 %v2939_v11  ;;  %v3635_v32 = vld [vmem:[%s5648_s9 + $0x90] sm:$0xff] }
 0x924   : > { %3903 = vmatpush3.msra.mxu0 %v2939_v11  ;;  %v3634_v11 = vld [vmem:[%s5648_s9 + $0x88] sm:$0xff] }
 0x925   : > { %3904 = vmatprep.subr.mxu0 %v2938_v59 }
 0x926   : > { %3905 = vmatpush3.msra.mxu0 %v2938_v59  ;;  %v3223_v59 = vpop.permute.xlu0 %3222 }
 0x927   : > { %3906 = vmatprep.subr.mxu0 %v2937_v37 }
 0x928   : > { %3907 = vmatpush3.msra.mxu0 %v2937_v37  ;;  %v3228_v37 = vpop.permute.xlu1 %3227 }
 0x929   : > { %3908 = vmatprep.subr.mxu0 %v2936_v10 }
 0x92a   : > { %3909 = vmatpush3.msra.mxu0 %v2936_v10 }
 0x92b   : > { %3911 = vmatmul.mubr.msk.f32.vlgmr.msra.gmra.mxu0 %vm1764_vm5, %v3610_v41 }
 0x92c   : > { %3913 = vmatprep.mubr.msk.f32.mxu0 %vm1764_vm5, %v3611_v18  ;;  %v3233_v18 = vpop.permute.xlu0 %3232 }
 0x92f   : > { %3914 = vmatmul.mubr.msk.f32.gmra.mxu0 %vm1764_vm5, %v3612_v62 }
 0x9eb   : > { %v3912_v38 = vpop.f32.mrf.mxu0 }
 0x9ec   : > { %v3049_v23 = vadd.f32 %v3912_v38, %v2953_v6  ;;  %v3347_v6 = vpop.permute.xlu1 %3346 }
 0x9ed   : > { %v3043_v43 = vpop.f32.mrf.mxu0 }
 0x9ee   : > { %v3044_v13 = vadd.f32 %v3043_v43, %v2948_v61  ;;  %v3063_v48 = vadd.f32 %v3049_v23, %v5506_v5 }
 0x9ef   : > { %v3915_v26 = vpop.f32.mrf.mxu0 }
 0x9f0   : > { %v3059_v21 = vadd.f32 %v3915_v26, %v2963_v56  ;;  %v3062_v63 = vadd.f32 %v3044_v13, %v5511_v53  ;;  %v3067_v1 = vadd.f32 %v3063_v48, %v1977_v47  ;;  %v3633_v53 = vld [vmem:[%s5648_s9 + $0x80] sm:$0xff]  ;;  %v3352_v26 = vpop.permute.xlu0 %3351 }
 0x9f1   : > { %v3053_v8 = vpop.f32.mrf.mxu0  ;;  %3938 = vmatprep.mubr.msk.f32.mxu0 %vm1764_vm5, %v3633_v53 }
 0x9f2   : > { %v3065_v17 = vadd.f32 %v3059_v21, %v5502_v51  ;;  %v3054_v20 = vadd.f32 %v3053_v8, %v2958_v7  ;;  %v3066_v51 = vadd.f32 %v3062_v63, %v1972_v49  ;;  %v3076_v30 = vmax.f32 %v3067_v1, 0.0 }
 0x9f4   : > { %v5554_v12 = vadd.f32 %v3065_v17, %v1987_v16  ;;  %v3064_v35 = vadd.f32 %v3054_v20, %v5508_v39  ;;  %v3075_v5 = vmax.f32 %v3066_v51, 0.0  ;;  %v3623_v39 = vld [vmem:[%s5646_s7 + $0x90] sm:$0xff]  ;;  %v3357_v17 = vpop.permute.xlu1 %3356 }
 0x9f6   : > { %v5558_v44 = vadd.f32 %v3064_v35, %v1982_v52  ;;  %v3078_v45 = vmax.f32 %v5554_v12, 0.0  ;;  %v3362_v52 = vpop.permute.xlu0 %3361 }
 0x9f8   : > { %3916 = vmatprep.subr.mxu1 %v3078_v45  ;;  %v3077_v0 = vmax.f32 %v5558_v44, 0.0 }
 0x9f9   : > { %3917 = vmatpush3.msra.mxu1 %v3078_v45 }
 0x9fa   : > { %3918 = vmatprep.subr.mxu1 %v3077_v0 }
 0x9fb   : > { %3919 = vmatpush3.msra.mxu1 %v3077_v0 }
 0x9fc   : > { %3920 = vmatprep.subr.mxu1 %v3076_v30 }
 0x9fd   : > { %3921 = vmatpush3.msra.mxu1 %v3076_v30 }
 0x9fe   : > { %3922 = vmatprep.subr.mxu1 %v3075_v5 }
 0x9ff   : > { %3923 = vmatpush3.msra.mxu1 %v3075_v5 }
 0xa00   : > { %3925 = vmatmul.mubr.msk.f32.vlgmr.msra.gmra.mxu1 %vm1764_vm5, %v3622_v60 }
 0xa01   : > { %3927 = vmatprep.mubr.msk.f32.mxu1 %vm1764_vm5, %v3623_v39 }
 0xa04   : > { %3928 = vmatmul.mubr.msk.f32.gmra.mxu1 %vm1764_vm5, %v3624_v15 }
 0xac0   : > { %v3926_v42 = vpop.f32.mrf.mxu1 }
 0xac1   : > { %v3188_v54 = vadd.f32 %v3926_v42, %v3092_v50 }
 0xac2   : > { %v3182_v28 = vpop.f32.mrf.mxu1 }
 0xac3   : > { %v3183_v22 = vadd.f32 %v3182_v28, %v3087_v31  ;;  %v3207_v2 = vmax.f32 %v3188_v54, 0.0 }
 0xac4   : > { %v3929_v9 = vpop.f32.mrf.mxu1 }
 0xac5   : > { %v3198_v19 = vadd.f32 %v3929_v9, %v3102_v29  ;;  %v3206_v58 = vmax.f32 %v3183_v22, 0.0 }
 0xac6   : > { %v3192_v33 = vpop.f32.mrf.mxu1 }
 0xac7   : > { %v3209_v40 = vmax.f32 %v3198_v19, 0.0  ;;  %v3193_v57 = vadd.f32 %v3192_v33, %v3097_v27 }
 0xac9   : > { %v3208_v55 = vmax.f32 %v3193_v57, 0.0  ;;  %3930 = vmatprep.subr.mxu0 %v3209_v40 }
 0xaca   : > { %3931 = vmatpush3.msra.mxu0 %v3209_v40 }
 0xacb   : > { %3932 = vmatprep.subr.mxu0 %v3208_v55 }
 0xacc   : > { %3933 = vmatpush3.msra.mxu0 %v3208_v55 }
 0xacd   : > { %3934 = vmatprep.subr.mxu0 %v3207_v2 }
 0xace   : > { %3935 = vmatpush3.msra.mxu0 %v3207_v2 }
 0xacf   : > { %3936 = vmatprep.subr.mxu0 %v3206_v58 }
 0xad0   : > { %3937 = vmatpush3.msra.mxu0 %v3206_v58 }
 0xad1   : > { %3939 = vmatmul.mubr.msk.f32.vlgmr.msra.gmra.mxu0 %vm1764_vm5, %v3634_v11 }
 0xad2   : > { %3941 = vmatprep.mubr.msk.f32.mxu0 %vm1764_vm5, %v3635_v32 }
 0xad5   : > { %3942 = vmatmul.mubr.msk.f32.gmra.mxu0 %vm1764_vm5, %v3636_v24 }
 0xb91   : > { %v3940_v10 = vpop.f32.mrf.mxu0 }
 0xb92   : > { %v3319_v41 = vadd.f32 %v3940_v10, %v3223_v59 }
 0xb93   : > { %v3313_v62 = vpop.f32.mrf.mxu0 }
 0xb94   : > { %v3333_v3 = vadd.f32 %v3319_v41, %v3067_v1  ;;  %v3314_v56 = vadd.f32 %v3313_v62, %v3218_v34 }
 0xb95   : > { %v3943_v4 = vpop.f32.mrf.mxu0 }
 0xb96   : > { %v3332_v7 = vadd.f32 %v3314_v56, %v3066_v51  ;;  %v3329_v36 = vadd.f32 %v3943_v4, %v3233_v18  ;;  %v3337_v43 = vmax.f32 %v3333_v3, 0.0 }
 0xb97   : > { %v3323_v38 = vpop.f32.mrf.mxu0 }
 0xb98   : > { %v3336_v25 = vmax.f32 %v3332_v7, 0.0  ;;  %v3335_v23 = vadd.f32 %v3329_v36, %v5554_v12  ;;  %v3324_v61 = vadd.f32 %v3323_v38, %v3228_v37  ;;  %v3365_v8 = vmul.f32 %v3352_v26, %v3337_v43 }
 0xb9a   : > { %v3364_v13 = vmul.f32 %v3347_v6, %v3336_v25  ;;  %v3334_v21 = vadd.f32 %v3324_v61, %v5558_v44  ;;  %v3339_v16 = vmax.f32 %v3335_v23, 0.0  ;;  %v3381_v44 = vpop.permute.xlu1 %3380 }
 0xb9b   : > { %v3386_v0 = vrot.slane %v3381_v44, %v4580_v46 }
 0xb9c   : > { %v3338_v48 = vmax.f32 %v3334_v21, 0.0  ;;  %v3368_v20 = vadd.f32 %v3365_v8, %v3364_v13  ;;  %v3367_v63 = vmul.f32 %v3362_v52, %v3339_v16 }
 0xb9e   : > { %v3366_v47 = vmul.f32 %v3357_v17, %v3338_v48 }
 0xba0   : > { %v3369_v35 = vadd.f32 %v3368_v20, %v3366_v47 }
 0xba2   : > { %v3370_v14 = vadd.f32 %v3369_v35, %v3367_v63 }
 0xba4   : > { %v3371_v49 = vrot.slane %v3370_v14, 4 }
 0xba6   : > { %v3372_v12 = vadd.f32 %v3371_v49, %v3370_v14 }
 0xba8   : > { %v3373_v1 = vrot.slane %v3372_v12, 2 }
 0xbaa   : > { %v3374_v45 = vadd.f32 %v3373_v1, %v3372_v12 }
 0xbac   : > { %v3375_v51 = vrot.slane %v3374_v45, 1 }
 0xbae   : > { %v3376_v30 = vadd.f32 %v3375_v51, %v3374_v45 }
 0xbb0   : > { %v3387_v5 = vadd.f32 %v3386_v0, %v3376_v30 }
 0xbb2   : > { %3388 = vst [vmem:[%s486_s19] sm:$0x1] %v3387_v5 }
 0xbb3   : > { %4188 = shalt.err (!%p4185_p7)
}
 0xbb4   : > { %s4189_s24 = scalar_lea.hbm %s3402_s16, 16  ;;  %s4193_s19 = scalar_lea.hbm %s5652_s13, 64 }
 0xbb5   : > { %p4190_p9 = scmp.ne.s32.totalorder %s3402_s16, %s4189_s24  ;;  %p4194_p12 = scmp.lt.s32.totalorder %s3402_s16, %s5652_s13 }
 0xbb6   : > { %p4195_p13 = scmp.lt.s32.totalorder %s4193_s19, %s4189_s24 }
 0xbb7   : > { %p4191_p10 = pnand %p4190_p9, %p4398_p3 }
 0xbb8   : > { %p4196_p0 = por %p4195_p13, %p4194_p12 }
 0xbb9   : > { %p4192_p11 = pneg %p4191_p10 }
 0xbbb   : > { %p4197_p1 = pnand %p4196_p0, %p4192_p11 }
 0xbbd   : > { %4200 = shalt.err (!%p4197_p1)
}
 0xbbe   : > { %3946 = dma.vmem_to_hbm [thread:$0]  (%p4398_p3), %s3405_s2, 16, %s3402_s16, %s3390_s14  }
 0xbbf PF: > { %p3952_p2 = scmp.ge.s32.totalorder %s4267_s17, 2  ;;  %s3416_s25 = sand.u32 1, %s4239_s27  }
 0xbc0   : > { %s3417_s30 = scalar_lea.sflag [#allocation5], %s3416_s25 }
 0xbc1   : > { %p3949_p4 = pnand %p3952_p2, %p4407_p8 }
 0xbc3   : > { %p3950_p5 = pneg %p3949_p4 }
 0xbc5   : > { %4234 = dma.done.wait (%p3950_p5), %s3417_s30, 16  }
 0xbc6   : > { %4236 = vsyncadd (%p3950_p5), %s3417_s30, 4294967280  ;;  %s28_s17 = sadd.s32 1, %s4267_s17   ;;  %s5667_s14 = sld [smem:[#allocation7_spill]] }
 0xbc7   : > { %p25_p6 = scmp.ge.s32.totalorder %s28_s17, 6   ;;  %s5668_s22 = sld [smem:[#allocation8_spill]] }
 0xbc8   : > { %s5669_s16 = sld [smem:[#allocation9_spill]]  ;;  %s5670_s27 = smov %s4243_s28 }
 0xbc9   : > { %s5671_s28 = smov %s4247_s29  ;;  %s5672_s29 = smov %s4416_s12 }
 0xbca   : > { %s5673_s30 = smov %s4259_s15  ;;  %27 = sbr.rel (!%p25_p6) target bundleno = 9 (0x9), region = 129 }
 0xbcd   : > { %s5674_s15 = smov %s5668_s22 }
 0xbcf   :  { %3421 = vsyncpa [#allocation5], 1 }
 0xbd0   :  { %3423 = vsyncpa [#allocation5 + $0x1], 1 }

</bundles_post_ra>
